<compile_context>
chip_gen: v7x
topology: tpu7x:2x2x1
jax: 0.10.0
libtpu: 0.0.40
codegen_flags: <defaults>
</compile_context>

<pallas_src>
import jax
import jax.numpy as jnp
from jax import lax
from jax.experimental import pallas as pl
from jax.experimental.pallas import tpu as pltpu


def lstm_kernel(x_ref, wih0_ref, whh0_ref, b0_ref,
                w1s_ref, b1_ref, fcw_ref, fcb_ref,
                out_ref, xg0_ref):
    """Fused 2-layer LSTM forward + linear head for one batch tile.

    x_ref    : (T, Bb, I)  time-major input tile
    wih0_ref : (I, 4H)     layer-0 input weights (pre-transposed)
    whh0_ref : (H, 4H)     layer-0 recurrent weights (pre-transposed)
    b0_ref   : (1, 4H)     layer-0 combined bias (b_ih + b_hh)
    w1s_ref  : (2H, 4H)    layer-1 stacked weights  [wih1 ; whh1]
    b1_ref   : (1, 4H)     layer-1 combined bias
    fcw_ref  : (1, H)      fc weight row (pre-transposed); fcb_ref : (1, 1)
    out_ref  : (Bb, 1)
    xg0_ref  : (T*Bb, 4H)  VMEM scratch for the hoisted layer-0 input projection
    """
    T = x_ref.shape[0]
    Bb = out_ref.shape[0]
    I = x_ref.shape[2]
    H = whh0_ref.shape[0]

    # ---- hoisted layer-0 input->gates projection: one matmul + bias, staged in VMEM ----
    x_flat = x_ref[...].reshape(T * Bb, I)                      # layout-trivial collapse
    xg0_ref[...] = (jnp.dot(x_flat, wih0_ref[...],
                            preferred_element_type=jnp.float32)
                    + b0_ref[...])                              # (T*Bb, 4H)

    whh0 = whh0_ref[...]                                        # (H, 4H)
    w1s = w1s_ref[...]                                          # (2H, 4H)
    b1 = jnp.broadcast_to(b1_ref[...], (Bb, 4 * H))             # hoisted (no CSE of broadcasts)

    # Hoisted lane mask / scale: which lanes of the (Bb, 4H) gates vreg hold the g (tanh) gate.
    lane = lax.broadcasted_iota(jnp.int32, (Bb, 4 * H), dimension=1)
    is_g = (lane >= 2 * H) & (lane < 3 * H)
    pre_scale = jnp.where(is_g, 1.0, 0.5).astype(jnp.float32)   # tanh lanes x1, sigmoid lanes x0.5

    def activate(gates):
        # Single EUP pass: sigmoid(x) = 0.5*(1 + tanh(x/2)); tanh lanes pass through.
        th = jnp.tanh(gates * pre_scale)
        act = jnp.where(is_g, th, 0.5 * th + 0.5)
        return (act[:, 0 * H:1 * H],      # i
                act[:, 1 * H:2 * H],      # f
                act[:, 2 * H:3 * H],      # g
                act[:, 3 * H:4 * H])      # o

    zeros = jnp.zeros((Bb, H), jnp.float32)

    def step(t, carry):
        h0, c0, h1, c1 = carry

        # ---- layer 0: only the recurrent matmul remains on the serial path ----
        row = pl.multiple_of(t * Bb, 8)                         # Bb is sublane-aligned
        g0 = (xg0_ref[pl.ds(row, Bb), :]
              + jnp.dot(h0, whh0, preferred_element_type=jnp.float32))
        i0, f0, gg0, o0 = activate(g0)
        c0 = f0 * c0 + i0 * gg0
        h0 = o0 * jnp.tanh(c0)

        # ---- layer 1: single merged matmul with stacked weights ----
        # TODO(synk): training-mode inter-layer dropout (p=0.3) would apply to h0 here.
        lhs = jnp.concatenate([h0, h1], axis=-1)                # (Bb, 2H) = [h0_t | h1_{t-1}]
        g1 = jnp.dot(lhs, w1s, preferred_element_type=jnp.float32) + b1
        i1, f1, gg1, o1 = activate(g1)
        c1 = f1 * c1 + i1 * gg1
        h1 = o1 * jnp.tanh(c1)
        return (h0, c0, h1, c1)

    # Fully unrolled, state in vregs for the whole recurrence.
    h0, c0, h1, c1 = lax.fori_loop(0, T, step, (zeros, zeros, zeros, zeros),
                                   unroll=True)

    # ---- fc head on the last hidden state of the top layer: VPU multiply + lane reduce ----
    out_ref[...] = (jnp.sum(h1 * fcw_ref[...], axis=-1, keepdims=True)
                    + fcb_ref[...]).astype(out_ref.dtype)


def lstm_forward_pallas(x_btd, params, *, block_b=None):
    """x_btd: (B, T, I) batch-first input (PyTorch convention). Returns (B, 1)."""
    B, T, I = x_btd.shape
    H = params["whh0"].shape[0]

    if block_b is None:
        block_b = min(B, 128)           # tile large served batches; B=8 -> single tile
    assert B % block_b == 0, (B, block_b)

    # Time-major layout so each step's gate slice is a contiguous sublane block.
    # allow_input_fusion lets XLA fold the transpose into the pallas_call producer.
    x_tbd = jnp.transpose(x_btd, (1, 0, 2))                     # (T, B, I)

    vmem = pl.BlockSpec(memory_space=pltpu.MemorySpace.VMEM)    # whole-array weight blocks

    return pl.pallas_call(
        lstm_kernel,
        out_shape=jax.ShapeDtypeStruct((B, 1), jnp.float32),
        grid_spec=pltpu.PrefetchScalarGridSpec(
            num_scalar_prefetch=0,
            grid=(B // block_b,),
            in_specs=[
                pl.BlockSpec((T, block_b, I), lambda i: (0, i, 0)),   # x tile
                vmem,   # wih0
                vmem,   # whh0
                vmem,   # b0
                vmem,   # w1s (stacked [wih1; whh1])
                vmem,   # b1
                vmem,   # fcw_t
                vmem,   # fcb
            ],
            out_specs=pl.BlockSpec((block_b, 1), lambda i: (i, 0)),
            scratch_shapes=[pltpu.VMEM((T * block_b, 4 * H), jnp.float32)],
        ),
        compiler_params=pltpu.CompilerParams(
            dimension_semantics=("parallel",),
            allow_input_fusion=[True] + [False] * 7),
    )(x_tbd,
      params["wih0"], params["whh0"], params["b0"],
      params["w1s"], params["b1"],
      params["fcw_t"], params["fcb"])


# ---------------- pure-JAX reference (PyTorch nn.LSTM semantics) ----------------
def lstm_forward_ref(x_btd, params):
    B, T, I = x_btd.shape
    H = params["whh0"].shape[0]

    def run_layer(seq, wih, whh, b):
        h = jnp.zeros((B, H), jnp.float32)
        c = jnp.zeros((B, H), jnp.float32)
        outs = []
        for t in range(T):
            gates = seq[:, t, :] @ wih + h @ whh + b
            i_g = jax.nn.sigmoid(gates[:, 0 * H:1 * H])
            f_g = jax.nn.sigmoid(gates[:, 1 * H:2 * H])
            g_g = jnp.tanh(gates[:, 2 * H:3 * H])
            o_g = jax.nn.sigmoid(gates[:, 3 * H:4 * H])
            c = f_g * c + i_g * g_g
            h = o_g * jnp.tanh(c)
            outs.append(h)
        return jnp.stack(outs, axis=1), h

    seq1, _ = run_layer(x_btd, params["wih0"], params["whh0"], params["b0"])
    _, h_last = run_layer(seq1, params["wih1"], params["whh1"], params["b1"])
    return h_last @ params["fcw"] + params["fcb"]


def make_params(key, input_size, hidden_size):
    """Deterministic PyTorch-style init: U(-1/sqrt(H), 1/sqrt(H))."""
    H = hidden_size
    k = 1.0 / jnp.sqrt(jnp.float32(H))
    keys = jax.random.split(key, 12)

    def u(kk, shape):
        return jax.random.uniform(kk, shape, jnp.float32, minval=-k, maxval=k)

    # Stored pre-transposed so the kernel does x @ W directly.
    wih0 = u(keys[0], (input_size, 4 * H))
    whh0 = u(keys[1], (H, 4 * H))
    b0 = u(keys[2], (1, 4 * H)) + u(keys[3], (1, 4 * H))   # b_ih + b_hh
    wih1 = u(keys[4], (H, 4 * H))
    whh1 = u(keys[5], (H, 4 * H))
    b1 = u(keys[6], (1, 4 * H)) + u(keys[7], (1, 4 * H))
    fcw = u(keys[8], (H, 1))
    fcb = u(keys[9], (1, 1))
    w1s = jnp.concatenate([wih1, whh1], axis=0)            # (2H, 4H) stacked layer-1 weight
    return dict(wih0=wih0, whh0=whh0, b0=b0,
                wih1=wih1, whh1=whh1, b1=b1, w1s=w1s,
                fcw=fcw, fcw_t=jnp.transpose(fcw), fcb=fcb)


if __name__ == "__main__":
    B, T, I, H = 8, 8, 4, 32

    key = jax.random.PRNGKey(0)
    kx, kp = jax.random.split(key)
    x = jax.random.normal(kx, (B, T, I), jnp.float32)   # (batch, seq, features)
    params = make_params(kp, I, H)

    out = jax.jit(lstm_forward_pallas)(x, params)
    out = jax.block_until_ready(out)

    ref = lstm_forward_ref(x, params)
    assert out.shape == (B, 1), out.shape
    # Slightly looser than pure-f32 parity: sigmoid is computed via tanh (single EUP pass).
    assert jnp.allclose(out, ref, rtol=2e-4, atol=1e-4), (
        f"max abs err = {jnp.max(jnp.abs(out - ref))}")

    print("KERNEL_OK")
</pallas_src>

<mosaic_0001>
module attributes {stable_mosaic.version = 11 : i64} {
  func.func @lstm_kernel(%arg0: i32, %arg1: memref<8x8x4xf32, #tpu.memory_space<vmem>>, %arg2: memref<4x128xf32, #tpu.memory_space<vmem>>, %arg3: memref<32x128xf32, #tpu.memory_space<vmem>>, %arg4: memref<1x128xf32, #tpu.memory_space<vmem>>, %arg5: memref<64x128xf32, #tpu.memory_space<vmem>>, %arg6: memref<1x128xf32, #tpu.memory_space<vmem>>, %arg7: memref<1x32xf32, #tpu.memory_space<vmem>>, %arg8: memref<1x1xf32, #tpu.memory_space<vmem>>, %arg9: memref<8x1xf32, #tpu.memory_space<vmem>>, %arg10: memref<64x128xf32, #tpu.memory_space<vmem>>) attributes {dimension_semantics = [#tpu.dimension_semantics<parallel>], iteration_bounds = array<i64: 1>, scalar_prefetch = 0 : i64, scratch_operands = 1 : i64, tpu.core_type = #tpu.core_type<tc>, window_params = [{transform_indices = @transform_0, window_bounds = array<i64: 8, 8, 4>}, {pipeline_mode = #tpu.pipeline_mode<synchronous>, transform_indices = @transform_1, window_bounds = array<i64: 4, 128>}, {pipeline_mode = #tpu.pipeline_mode<synchronous>, transform_indices = @transform_2, window_bounds = array<i64: 32, 128>}, {pipeline_mode = #tpu.pipeline_mode<synchronous>, transform_indices = @transform_3, window_bounds = array<i64: 1, 128>}, {pipeline_mode = #tpu.pipeline_mode<synchronous>, transform_indices = @transform_4, window_bounds = array<i64: 64, 128>}, {pipeline_mode = #tpu.pipeline_mode<synchronous>, transform_indices = @transform_5, window_bounds = array<i64: 1, 128>}, {pipeline_mode = #tpu.pipeline_mode<synchronous>, transform_indices = @transform_6, window_bounds = array<i64: 1, 32>}, {pipeline_mode = #tpu.pipeline_mode<synchronous>, transform_indices = @transform_7, window_bounds = array<i64: 1, 1>}, {transform_indices = @transform_8, window_bounds = array<i64: 8, 1>}]} {
    %c0 = arith.constant 0 : index
    %c0_0 = arith.constant 0 : index
    %c0_1 = arith.constant 0 : index
    %0 = vector.load %arg1[%c0, %c0_0, %c0_1] : memref<8x8x4xf32, #tpu.memory_space<vmem>>, vector<8x8x4xf32>
    %1 = vector.shape_cast %0 : vector<8x8x4xf32> to vector<64x4xf32>
    %c0_2 = arith.constant 0 : index
    %c0_3 = arith.constant 0 : index
    %2 = vector.load %arg2[%c0_2, %c0_3] : memref<4x128xf32, #tpu.memory_space<vmem>>, vector<4x128xf32>
    %cst = arith.constant dense<0.000000e+00> : vector<64x128xf32>
    %3 = tpu.matmul %1, %2, %cst {dimension_numbers = #tpu.dot_dimension_numbers<[1], [0], [0], [1], [0, 0, 1, 1], [], []>} : vector<64x4xf32>, vector<4x128xf32>, vector<64x128xf32> -> vector<64x128xf32>
    %c0_4 = arith.constant 0 : index
    %c0_5 = arith.constant 0 : index
    %4 = vector.load %arg4[%c0_4, %c0_5] : memref<1x128xf32, #tpu.memory_space<vmem>>, vector<1x128xf32>
    %5 = vector.broadcast %4 : vector<1x128xf32> to vector<64x128xf32>
    %6 = arith.addf %3, %5 : vector<64x128xf32>
    %c0_6 = arith.constant 0 : index
    %c0_7 = arith.constant 0 : index
    %7 = vector.load %arg10[%c0_6, %c0_7] : memref<64x128xf32, #tpu.memory_space<vmem>>, vector<64x128xf32>
    tpu.vector_store %arg10[%c0_6, %c0_7], %6 {strides = array<i32>} : memref<64x128xf32, #tpu.memory_space<vmem>>, vector<64x128xf32>,
    %c0_8 = arith.constant 0 : index
    %c0_9 = arith.constant 0 : index
    %8 = vector.load %arg3[%c0_8, %c0_9] : memref<32x128xf32, #tpu.memory_space<vmem>>, vector<32x128xf32>
    %c0_10 = arith.constant 0 : index
    %c0_11 = arith.constant 0 : index
    %9 = vector.load %arg5[%c0_10, %c0_11] : memref<64x128xf32, #tpu.memory_space<vmem>>, vector<64x128xf32>
    %c0_12 = arith.constant 0 : index
    %c0_13 = arith.constant 0 : index
    %10 = vector.load %arg6[%c0_12, %c0_13] : memref<1x128xf32, #tpu.memory_space<vmem>>, vector<1x128xf32>
    %11 = vector.shape_cast %10 : vector<1x128xf32> to vector<1x128xf32>
    %12 = vector.broadcast %11 : vector<1x128xf32> to vector<8x128xf32>
    %13 = tpu.iota {dimensions = array<i32: 1>} : vector<8x128xi32>
    %c64_i32 = arith.constant 64 : i32
    %14 = vector.broadcast %c64_i32 : i32 to vector<8x128xi32>
    %15 = arith.cmpi sge, %13, %14 : vector<8x128xi32>
    %c96_i32 = arith.constant 96 : i32
    %16 = vector.broadcast %c96_i32 : i32 to vector<8x128xi32>
    %17 = arith.cmpi slt, %13, %16 : vector<8x128xi32>
    %18 = arith.andi %15, %17 : vector<8x128xi1>
    %cst_14 = arith.constant 1.000000e+00 : f32
    %cst_15 = arith.constant 5.000000e-01 : f32
    %19 = vector.broadcast %cst_14 : f32 to vector<8x128xf32>
    %20 = vector.broadcast %cst_15 : f32 to vector<8x128xf32>
    %21 = arith.select %18, %19, %20 : vector<8x128xi1>, vector<8x128xf32>
    %cst_16 = arith.constant 0.000000e+00 : f32
    %22 = vector.broadcast %cst_16 : f32 to vector<8x32xf32>
    %c0_i32 = arith.constant 0 : i32
    %c8_i32 = arith.constant 8 : i32
    %23 = arith.muli %c0_i32, %c8_i32 : i32
    %24 = tpu.assume_multiple %23, 8 : i32
    %25 = arith.index_cast %24 : i32 to index
    %c0_17 = arith.constant 0 : index
    %26 = vector.load %arg10[%25, %c0_17] : memref<64x128xf32, #tpu.memory_space<vmem>>, vector<8x128xf32>
    %cst_18 = arith.constant dense<0.000000e+00> : vector<8x128xf32>
    %27 = tpu.matmul %22, %8, %cst_18 {dimension_numbers = #tpu.dot_dimension_numbers<[1], [0], [0], [1], [0, 0, 1, 1], [], []>} : vector<8x32xf32>, vector<32x128xf32>, vector<8x128xf32> -> vector<8x128xf32>
    %28 = arith.addf %26, %27 : vector<8x128xf32>
    %29 = arith.mulf %28, %21 : vector<8x128xf32>
    %30 = math.tanh %29 : vector<8x128xf32>
    %cst_19 = arith.constant 5.000000e-01 : f32
    %31 = vector.broadcast %cst_19 : f32 to vector<8x128xf32>
    %32 = arith.mulf %31, %30 : vector<8x128xf32>
    %cst_20 = arith.constant 5.000000e-01 : f32
    %33 = vector.broadcast %cst_20 : f32 to vector<8x128xf32>
    %34 = arith.addf %32, %33 : vector<8x128xf32>
    %35 = arith.select %18, %30, %34 : vector<8x128xi1>, vector<8x128xf32>
    %36 = vector.extract_strided_slice %35 {offsets = [0, 0], sizes = [8, 32], strides = [1, 1]} : vector<8x128xf32> to vector<8x32xf32>
    %37 = vector.extract_strided_slice %35 {offsets = [0, 32], sizes = [8, 32], strides = [1, 1]} : vector<8x128xf32> to vector<8x32xf32>
    %38 = vector.extract_strided_slice %35 {offsets = [0, 64], sizes = [8, 32], strides = [1, 1]} : vector<8x128xf32> to vector<8x32xf32>
    %39 = vector.extract_strided_slice %35 {offsets = [0, 96], sizes = [8, 32], strides = [1, 1]} : vector<8x128xf32> to vector<8x32xf32>
    %40 = arith.mulf %37, %22 : vector<8x32xf32>
    %41 = arith.mulf %36, %38 : vector<8x32xf32>
    %42 = arith.addf %40, %41 : vector<8x32xf32>
    %43 = math.tanh %42 : vector<8x32xf32>
    %44 = arith.mulf %39, %43 : vector<8x32xf32>
    %45 = tpu.concatenate %44, %22 in 1 : vector<8x32xf32>, vector<8x32xf32> -> vector<8x64xf32>
    %cst_21 = arith.constant dense<0.000000e+00> : vector<8x128xf32>
    %46 = tpu.matmul %45, %9, %cst_21 {dimension_numbers = #tpu.dot_dimension_numbers<[1], [0], [0], [1], [0, 0, 1, 1], [], []>} : vector<8x64xf32>, vector<64x128xf32>, vector<8x128xf32> -> vector<8x128xf32>
    %47 = arith.addf %46, %12 : vector<8x128xf32>
    %48 = arith.mulf %47, %21 : vector<8x128xf32>
    %49 = math.tanh %48 : vector<8x128xf32>
    %cst_22 = arith.constant 5.000000e-01 : f32
    %50 = vector.broadcast %cst_22 : f32 to vector<8x128xf32>
    %51 = arith.mulf %50, %49 : vector<8x128xf32>
    %cst_23 = arith.constant 5.000000e-01 : f32
    %52 = vector.broadcast %cst_23 : f32 to vector<8x128xf32>
    %53 = arith.addf %51, %52 : vector<8x128xf32>
    %54 = arith.select %18, %49, %53 : vector<8x128xi1>, vector<8x128xf32>
    %55 = vector.extract_strided_slice %54 {offsets = [0, 0], sizes = [8, 32], strides = [1, 1]} : vector<8x128xf32> to vector<8x32xf32>
    %56 = vector.extract_strided_slice %54 {offsets = [0, 32], sizes = [8, 32], strides = [1, 1]} : vector<8x128xf32> to vector<8x32xf32>
    %57 = vector.extract_strided_slice %54 {offsets = [0, 64], sizes = [8, 32], strides = [1, 1]} : vector<8x128xf32> to vector<8x32xf32>
    %58 = vector.extract_strided_slice %54 {offsets = [0, 96], sizes = [8, 32], strides = [1, 1]} : vector<8x128xf32> to vector<8x32xf32>
    %59 = arith.mulf %56, %22 : vector<8x32xf32>
    %60 = arith.mulf %55, %57 : vector<8x32xf32>
    %61 = arith.addf %59, %60 : vector<8x32xf32>
    %62 = math.tanh %61 : vector<8x32xf32>
    %63 = arith.mulf %58, %62 : vector<8x32xf32>
    %c1_i32 = arith.constant 1 : i32
    %c8_i32_24 = arith.constant 8 : i32
    %64 = arith.muli %c1_i32, %c8_i32_24 : i32
    %65 = tpu.assume_multiple %64, 8 : i32
    %66 = arith.index_cast %65 : i32 to index
    %c0_25 = arith.constant 0 : index
    %67 = vector.load %arg10[%66, %c0_25] : memref<64x128xf32, #tpu.memory_space<vmem>>, vector<8x128xf32>
    %cst_26 = arith.constant dense<0.000000e+00> : vector<8x128xf32>
    %68 = tpu.matmul %44, %8, %cst_26 {dimension_numbers = #tpu.dot_dimension_numbers<[1], [0], [0], [1], [0, 0, 1, 1], [], []>} : vector<8x32xf32>, vector<32x128xf32>, vector<8x128xf32> -> vector<8x128xf32>
    %69 = arith.addf %67, %68 : vector<8x128xf32>
    %70 = arith.mulf %69, %21 : vector<8x128xf32>
    %71 = math.tanh %70 : vector<8x128xf32>
    %cst_27 = arith.constant 5.000000e-01 : f32
    %72 = vector.broadcast %cst_27 : f32 to vector<8x128xf32>
    %73 = arith.mulf %72, %71 : vector<8x128xf32>
    %cst_28 = arith.constant 5.000000e-01 : f32
    %74 = vector.broadcast %cst_28 : f32 to vector<8x128xf32>
    %75 = arith.addf %73, %74 : vector<8x128xf32>
    %76 = arith.select %18, %71, %75 : vector<8x128xi1>, vector<8x128xf32>
    %77 = vector.extract_strided_slice %76 {offsets = [0, 0], sizes = [8, 32], strides = [1, 1]} : vector<8x128xf32> to vector<8x32xf32>
    %78 = vector.extract_strided_slice %76 {offsets = [0, 32], sizes = [8, 32], strides = [1, 1]} : vector<8x128xf32> to vector<8x32xf32>
    %79 = vector.extract_strided_slice %76 {offsets = [0, 64], sizes = [8, 32], strides = [1, 1]} : vector<8x128xf32> to vector<8x32xf32>
    %80 = vector.extract_strided_slice %76 {offsets = [0, 96], sizes = [8, 32], strides = [1, 1]} : vector<8x128xf32> to vector<8x32xf32>
    %81 = arith.mulf %78, %42 : vector<8x32xf32>
    %82 = arith.mulf %77, %79 : vector<8x32xf32>
    %83 = arith.addf %81, %82 : vector<8x32xf32>
    %84 = math.tanh %83 : vector<8x32xf32>
    %85 = arith.mulf %80, %84 : vector<8x32xf32>
    %86 = tpu.concatenate %85, %63 in 1 : vector<8x32xf32>, vector<8x32xf32> -> vector<8x64xf32>
    %cst_29 = arith.constant dense<0.000000e+00> : vector<8x128xf32>
    %87 = tpu.matmul %86, %9, %cst_29 {dimension_numbers = #tpu.dot_dimension_numbers<[1], [0], [0], [1], [0, 0, 1, 1], [], []>} : vector<8x64xf32>, vector<64x128xf32>, vector<8x128xf32> -> vector<8x128xf32>
    %88 = arith.addf %87, %12 : vector<8x128xf32>
    %89 = arith.mulf %88, %21 : vector<8x128xf32>
    %90 = math.tanh %89 : vector<8x128xf32>
    %cst_30 = arith.constant 5.000000e-01 : f32
    %91 = vector.broadcast %cst_30 : f32 to vector<8x128xf32>
    %92 = arith.mulf %91, %90 : vector<8x128xf32>
    %cst_31 = arith.constant 5.000000e-01 : f32
    %93 = vector.broadcast %cst_31 : f32 to vector<8x128xf32>
    %94 = arith.addf %92, %93 : vector<8x128xf32>
    %95 = arith.select %18, %90, %94 : vector<8x128xi1>, vector<8x128xf32>
    %96 = vector.extract_strided_slice %95 {offsets = [0, 0], sizes = [8, 32], strides = [1, 1]} : vector<8x128xf32> to vector<8x32xf32>
    %97 = vector.extract_strided_slice %95 {offsets = [0, 32], sizes = [8, 32], strides = [1, 1]} : vector<8x128xf32> to vector<8x32xf32>
    %98 = vector.extract_strided_slice %95 {offsets = [0, 64], sizes = [8, 32], strides = [1, 1]} : vector<8x128xf32> to vector<8x32xf32>
    %99 = vector.extract_strided_slice %95 {offsets = [0, 96], sizes = [8, 32], strides = [1, 1]} : vector<8x128xf32> to vector<8x32xf32>
    %100 = arith.mulf %97, %61 : vector<8x32xf32>
    %101 = arith.mulf %96, %98 : vector<8x32xf32>
    %102 = arith.addf %100, %101 : vector<8x32xf32>
    %103 = math.tanh %102 : vector<8x32xf32>
    %104 = arith.mulf %99, %103 : vector<8x32xf32>
    %c2_i32 = arith.constant 2 : i32
    %c8_i32_32 = arith.constant 8 : i32
    %105 = arith.muli %c2_i32, %c8_i32_32 : i32
    %106 = tpu.assume_multiple %105, 8 : i32
    %107 = arith.index_cast %106 : i32 to index
    %c0_33 = arith.constant 0 : index
    %108 = vector.load %arg10[%107, %c0_33] : memref<64x128xf32, #tpu.memory_space<vmem>>, vector<8x128xf32>
    %cst_34 = arith.constant dense<0.000000e+00> : vector<8x128xf32>
    %109 = tpu.matmul %85, %8, %cst_34 {dimension_numbers = #tpu.dot_dimension_numbers<[1], [0], [0], [1], [0, 0, 1, 1], [], []>} : vector<8x32xf32>, vector<32x128xf32>, vector<8x128xf32> -> vector<8x128xf32>
    %110 = arith.addf %108, %109 : vector<8x128xf32>
    %111 = arith.mulf %110, %21 : vector<8x128xf32>
    %112 = math.tanh %111 : vector<8x128xf32>
    %cst_35 = arith.constant 5.000000e-01 : f32
    %113 = vector.broadcast %cst_35 : f32 to vector<8x128xf32>
    %114 = arith.mulf %113, %112 : vector<8x128xf32>
    %cst_36 = arith.constant 5.000000e-01 : f32
    %115 = vector.broadcast %cst_36 : f32 to vector<8x128xf32>
    %116 = arith.addf %114, %115 : vector<8x128xf32>
    %117 = arith.select %18, %112, %116 : vector<8x128xi1>, vector<8x128xf32>
    %118 = vector.extract_strided_slice %117 {offsets = [0, 0], sizes = [8, 32], strides = [1, 1]} : vector<8x128xf32> to vector<8x32xf32>
    %119 = vector.extract_strided_slice %117 {offsets = [0, 32], sizes = [8, 32], strides = [1, 1]} : vector<8x128xf32> to vector<8x32xf32>
    %120 = vector.extract_strided_slice %117 {offsets = [0, 64], sizes = [8, 32], strides = [1, 1]} : vector<8x128xf32> to vector<8x32xf32>
    %121 = vector.extract_strided_slice %117 {offsets = [0, 96], sizes = [8, 32], strides = [1, 1]} : vector<8x128xf32> to vector<8x32xf32>
    %122 = arith.mulf %119, %83 : vector<8x32xf32>
    %123 = arith.mulf %118, %120 : vector<8x32xf32>
    %124 = arith.addf %122, %123 : vector<8x32xf32>
    %125 = math.tanh %124 : vector<8x32xf32>
    %126 = arith.mulf %121, %125 : vector<8x32xf32>
    %127 = tpu.concatenate %126, %104 in 1 : vector<8x32xf32>, vector<8x32xf32> -> vector<8x64xf32>
    %cst_37 = arith.constant dense<0.000000e+00> : vector<8x128xf32>
    %128 = tpu.matmul %127, %9, %cst_37 {dimension_numbers = #tpu.dot_dimension_numbers<[1], [0], [0], [1], [0, 0, 1, 1], [], []>} : vector<8x64xf32>, vector<64x128xf32>, vector<8x128xf32> -> vector<8x128xf32>
    %129 = arith.addf %128, %12 : vector<8x128xf32>
    %130 = arith.mulf %129, %21 : vector<8x128xf32>
    %131 = math.tanh %130 : vector<8x128xf32>
    %cst_38 = arith.constant 5.000000e-01 : f32
    %132 = vector.broadcast %cst_38 : f32 to vector<8x128xf32>
    %133 = arith.mulf %132, %131 : vector<8x128xf32>
    %cst_39 = arith.constant 5.000000e-01 : f32
    %134 = vector.broadcast %cst_39 : f32 to vector<8x128xf32>
    %135 = arith.addf %133, %134 : vector<8x128xf32>
    %136 = arith.select %18, %131, %135 : vector<8x128xi1>, vector<8x128xf32>
    %137 = vector.extract_strided_slice %136 {offsets = [0, 0], sizes = [8, 32], strides = [1, 1]} : vector<8x128xf32> to vector<8x32xf32>
    %138 = vector.extract_strided_slice %136 {offsets = [0, 32], sizes = [8, 32], strides = [1, 1]} : vector<8x128xf32> to vector<8x32xf32>
    %139 = vector.extract_strided_slice %136 {offsets = [0, 64], sizes = [8, 32], strides = [1, 1]} : vector<8x128xf32> to vector<8x32xf32>
    %140 = vector.extract_strided_slice %136 {offsets = [0, 96], sizes = [8, 32], strides = [1, 1]} : vector<8x128xf32> to vector<8x32xf32>
    %141 = arith.mulf %138, %102 : vector<8x32xf32>
    %142 = arith.mulf %137, %139 : vector<8x32xf32>
    %143 = arith.addf %141, %142 : vector<8x32xf32>
    %144 = math.tanh %143 : vector<8x32xf32>
    %145 = arith.mulf %140, %144 : vector<8x32xf32>
    %c3_i32 = arith.constant 3 : i32
    %c8_i32_40 = arith.constant 8 : i32
    %146 = arith.muli %c3_i32, %c8_i32_40 : i32
    %147 = tpu.assume_multiple %146, 8 : i32
    %148 = arith.index_cast %147 : i32 to index
    %c0_41 = arith.constant 0 : index
    %149 = vector.load %arg10[%148, %c0_41] : memref<64x128xf32, #tpu.memory_space<vmem>>, vector<8x128xf32>
    %cst_42 = arith.constant dense<0.000000e+00> : vector<8x128xf32>
    %150 = tpu.matmul %126, %8, %cst_42 {dimension_numbers = #tpu.dot_dimension_numbers<[1], [0], [0], [1], [0, 0, 1, 1], [], []>} : vector<8x32xf32>, vector<32x128xf32>, vector<8x128xf32> -> vector<8x128xf32>
    %151 = arith.addf %149, %150 : vector<8x128xf32>
    %152 = arith.mulf %151, %21 : vector<8x128xf32>
    %153 = math.tanh %152 : vector<8x128xf32>
    %cst_43 = arith.constant 5.000000e-01 : f32
    %154 = vector.broadcast %cst_43 : f32 to vector<8x128xf32>
    %155 = arith.mulf %154, %153 : vector<8x128xf32>
    %cst_44 = arith.constant 5.000000e-01 : f32
    %156 = vector.broadcast %cst_44 : f32 to vector<8x128xf32>
    %157 = arith.addf %155, %156 : vector<8x128xf32>
    %158 = arith.select %18, %153, %157 : vector<8x128xi1>, vector<8x128xf32>
    %159 = vector.extract_strided_slice %158 {offsets = [0, 0], sizes = [8, 32], strides = [1, 1]} : vector<8x128xf32> to vector<8x32xf32>
    %160 = vector.extract_strided_slice %158 {offsets = [0, 32], sizes = [8, 32], strides = [1, 1]} : vector<8x128xf32> to vector<8x32xf32>
    %161 = vector.extract_strided_slice %158 {offsets = [0, 64], sizes = [8, 32], strides = [1, 1]} : vector<8x128xf32> to vector<8x32xf32>
    %162 = vector.extract_strided_slice %158 {offsets = [0, 96], sizes = [8, 32], strides = [1, 1]} : vector<8x128xf32> to vector<8x32xf32>
    %163 = arith.mulf %160, %124 : vector<8x32xf32>
    %164 = arith.mulf %159, %161 : vector<8x32xf32>
    %165 = arith.addf %163, %164 : vector<8x32xf32>
    %166 = math.tanh %165 : vector<8x32xf32>
    %167 = arith.mulf %162, %166 : vector<8x32xf32>
    %168 = tpu.concatenate %167, %145 in 1 : vector<8x32xf32>, vector<8x32xf32> -> vector<8x64xf32>
    %cst_45 = arith.constant dense<0.000000e+00> : vector<8x128xf32>
    %169 = tpu.matmul %168, %9, %cst_45 {dimension_numbers = #tpu.dot_dimension_numbers<[1], [0], [0], [1], [0, 0, 1, 1], [], []>} : vector<8x64xf32>, vector<64x128xf32>, vector<8x128xf32> -> vector<8x128xf32>
    %170 = arith.addf %169, %12 : vector<8x128xf32>
    %171 = arith.mulf %170, %21 : vector<8x128xf32>
    %172 = math.tanh %171 : vector<8x128xf32>
    %cst_46 = arith.constant 5.000000e-01 : f32
    %173 = vector.broadcast %cst_46 : f32 to vector<8x128xf32>
    %174 = arith.mulf %173, %172 : vector<8x128xf32>
    %cst_47 = arith.constant 5.000000e-01 : f32
    %175 = vector.broadcast %cst_47 : f32 to vector<8x128xf32>
    %176 = arith.addf %174, %175 : vector<8x128xf32>
    %177 = arith.select %18, %172, %176 : vector<8x128xi1>, vector<8x128xf32>
    %178 = vector.extract_strided_slice %177 {offsets = [0, 0], sizes = [8, 32], strides = [1, 1]} : vector<8x128xf32> to vector<8x32xf32>
    %179 = vector.extract_strided_slice %177 {offsets = [0, 32], sizes = [8, 32], strides = [1, 1]} : vector<8x128xf32> to vector<8x32xf32>
    %180 = vector.extract_strided_slice %177 {offsets = [0, 64], sizes = [8, 32], strides = [1, 1]} : vector<8x128xf32> to vector<8x32xf32>
    %181 = vector.extract_strided_slice %177 {offsets = [0, 96], sizes = [8, 32], strides = [1, 1]} : vector<8x128xf32> to vector<8x32xf32>
    %182 = arith.mulf %179, %143 : vector<8x32xf32>
    %183 = arith.mulf %178, %180 : vector<8x32xf32>
    %184 = arith.addf %182, %183 : vector<8x32xf32>
    %185 = math.tanh %184 : vector<8x32xf32>
    %186 = arith.mulf %181, %185 : vector<8x32xf32>
    %c4_i32 = arith.constant 4 : i32
    %c8_i32_48 = arith.constant 8 : i32
    %187 = arith.muli %c4_i32, %c8_i32_48 : i32
    %188 = tpu.assume_multiple %187, 8 : i32
    %189 = arith.index_cast %188 : i32 to index
    %c0_49 = arith.constant 0 : index
    %190 = vector.load %arg10[%189, %c0_49] : memref<64x128xf32, #tpu.memory_space<vmem>>, vector<8x128xf32>
    %cst_50 = arith.constant dense<0.000000e+00> : vector<8x128xf32>
    %191 = tpu.matmul %167, %8, %cst_50 {dimension_numbers = #tpu.dot_dimension_numbers<[1], [0], [0], [1], [0, 0, 1, 1], [], []>} : vector<8x32xf32>, vector<32x128xf32>, vector<8x128xf32> -> vector<8x128xf32>
    %192 = arith.addf %190, %191 : vector<8x128xf32>
    %193 = arith.mulf %192, %21 : vector<8x128xf32>
    %194 = math.tanh %193 : vector<8x128xf32>
    %cst_51 = arith.constant 5.000000e-01 : f32
    %195 = vector.broadcast %cst_51 : f32 to vector<8x128xf32>
    %196 = arith.mulf %195, %194 : vector<8x128xf32>
    %cst_52 = arith.constant 5.000000e-01 : f32
    %197 = vector.broadcast %cst_52 : f32 to vector<8x128xf32>
    %198 = arith.addf %196, %197 : vector<8x128xf32>
    %199 = arith.select %18, %194, %198 : vector<8x128xi1>, vector<8x128xf32>
    %200 = vector.extract_strided_slice %199 {offsets = [0, 0], sizes = [8, 32], strides = [1, 1]} : vector<8x128xf32> to vector<8x32xf32>
    %201 = vector.extract_strided_slice %199 {offsets = [0, 32], sizes = [8, 32], strides = [1, 1]} : vector<8x128xf32> to vector<8x32xf32>
    %202 = vector.extract_strided_slice %199 {offsets = [0, 64], sizes = [8, 32], strides = [1, 1]} : vector<8x128xf32> to vector<8x32xf32>
    %203 = vector.extract_strided_slice %199 {offsets = [0, 96], sizes = [8, 32], strides = [1, 1]} : vector<8x128xf32> to vector<8x32xf32>
    %204 = arith.mulf %201, %165 : vector<8x32xf32>
    %205 = arith.mulf %200, %202 : vector<8x32xf32>
    %206 = arith.addf %204, %205 : vector<8x32xf32>
    %207 = math.tanh %206 : vector<8x32xf32>
    %208 = arith.mulf %203, %207 : vector<8x32xf32>
    %209 = tpu.concatenate %208, %186 in 1 : vector<8x32xf32>, vector<8x32xf32> -> vector<8x64xf32>
    %cst_53 = arith.constant dense<0.000000e+00> : vector<8x128xf32>
    %210 = tpu.matmul %209, %9, %cst_53 {dimension_numbers = #tpu.dot_dimension_numbers<[1], [0], [0], [1], [0, 0, 1, 1], [], []>} : vector<8x64xf32>, vector<64x128xf32>, vector<8x128xf32> -> vector<8x128xf32>
    %211 = arith.addf %210, %12 : vector<8x128xf32>
    %212 = arith.mulf %211, %21 : vector<8x128xf32>
    %213 = math.tanh %212 : vector<8x128xf32>
    %cst_54 = arith.constant 5.000000e-01 : f32
    %214 = vector.broadcast %cst_54 : f32 to vector<8x128xf32>
    %215 = arith.mulf %214, %213 : vector<8x128xf32>
    %cst_55 = arith.constant 5.000000e-01 : f32
    %216 = vector.broadcast %cst_55 : f32 to vector<8x128xf32>
    %217 = arith.addf %215, %216 : vector<8x128xf32>
    %218 = arith.select %18, %213, %217 : vector<8x128xi1>, vector<8x128xf32>
    %219 = vector.extract_strided_slice %218 {offsets = [0, 0], sizes = [8, 32], strides = [1, 1]} : vector<8x128xf32> to vector<8x32xf32>
    %220 = vector.extract_strided_slice %218 {offsets = [0, 32], sizes = [8, 32], strides = [1, 1]} : vector<8x128xf32> to vector<8x32xf32>
    %221 = vector.extract_strided_slice %218 {offsets = [0, 64], sizes = [8, 32], strides = [1, 1]} : vector<8x128xf32> to vector<8x32xf32>
    %222 = vector.extract_strided_slice %218 {offsets = [0, 96], sizes = [8, 32], strides = [1, 1]} : vector<8x128xf32> to vector<8x32xf32>
    %223 = arith.mulf %220, %184 : vector<8x32xf32>
    %224 = arith.mulf %219, %221 : vector<8x32xf32>
    %225 = arith.addf %223, %224 : vector<8x32xf32>
    %226 = math.tanh %225 : vector<8x32xf32>
    %227 = arith.mulf %222, %226 : vector<8x32xf32>
    %c5_i32 = arith.constant 5 : i32
    %c8_i32_56 = arith.constant 8 : i32
    %228 = arith.muli %c5_i32, %c8_i32_56 : i32
    %229 = tpu.assume_multiple %228, 8 : i32
    %230 = arith.index_cast %229 : i32 to index
    %c0_57 = arith.constant 0 : index
    %231 = vector.load %arg10[%230, %c0_57] : memref<64x128xf32, #tpu.memory_space<vmem>>, vector<8x128xf32>
    %cst_58 = arith.constant dense<0.000000e+00> : vector<8x128xf32>
    %232 = tpu.matmul %208, %8, %cst_58 {dimension_numbers = #tpu.dot_dimension_numbers<[1], [0], [0], [1], [0, 0, 1, 1], [], []>} : vector<8x32xf32>, vector<32x128xf32>, vector<8x128xf32> -> vector<8x128xf32>
    %233 = arith.addf %231, %232 : vector<8x128xf32>
    %234 = arith.mulf %233, %21 : vector<8x128xf32>
    %235 = math.tanh %234 : vector<8x128xf32>
    %cst_59 = arith.constant 5.000000e-01 : f32
    %236 = vector.broadcast %cst_59 : f32 to vector<8x128xf32>
    %237 = arith.mulf %236, %235 : vector<8x128xf32>
    %cst_60 = arith.constant 5.000000e-01 : f32
    %238 = vector.broadcast %cst_60 : f32 to vector<8x128xf32>
    %239 = arith.addf %237, %238 : vector<8x128xf32>
    %240 = arith.select %18, %235, %239 : vector<8x128xi1>, vector<8x128xf32>
    %241 = vector.extract_strided_slice %240 {offsets = [0, 0], sizes = [8, 32], strides = [1, 1]} : vector<8x128xf32> to vector<8x32xf32>
    %242 = vector.extract_strided_slice %240 {offsets = [0, 32], sizes = [8, 32], strides = [1, 1]} : vector<8x128xf32> to vector<8x32xf32>
    %243 = vector.extract_strided_slice %240 {offsets = [0, 64], sizes = [8, 32], strides = [1, 1]} : vector<8x128xf32> to vector<8x32xf32>
    %244 = vector.extract_strided_slice %240 {offsets = [0, 96], sizes = [8, 32], strides = [1, 1]} : vector<8x128xf32> to vector<8x32xf32>
    %245 = arith.mulf %242, %206 : vector<8x32xf32>
    %246 = arith.mulf %241, %243 : vector<8x32xf32>
    %247 = arith.addf %245, %246 : vector<8x32xf32>
    %248 = math.tanh %247 : vector<8x32xf32>
    %249 = arith.mulf %244, %248 : vector<8x32xf32>
    %250 = tpu.concatenate %249, %227 in 1 : vector<8x32xf32>, vector<8x32xf32> -> vector<8x64xf32>
    %cst_61 = arith.constant dense<0.000000e+00> : vector<8x128xf32>
    %251 = tpu.matmul %250, %9, %cst_61 {dimension_numbers = #tpu.dot_dimension_numbers<[1], [0], [0], [1], [0, 0, 1, 1], [], []>} : vector<8x64xf32>, vector<64x128xf32>, vector<8x128xf32> -> vector<8x128xf32>
    %252 = arith.addf %251, %12 : vector<8x128xf32>
    %253 = arith.mulf %252, %21 : vector<8x128xf32>
    %254 = math.tanh %253 : vector<8x128xf32>
    %cst_62 = arith.constant 5.000000e-01 : f32
    %255 = vector.broadcast %cst_62 : f32 to vector<8x128xf32>
    %256 = arith.mulf %255, %254 : vector<8x128xf32>
    %cst_63 = arith.constant 5.000000e-01 : f32
    %257 = vector.broadcast %cst_63 : f32 to vector<8x128xf32>
    %258 = arith.addf %256, %257 : vector<8x128xf32>
    %259 = arith.select %18, %254, %258 : vector<8x128xi1>, vector<8x128xf32>
    %260 = vector.extract_strided_slice %259 {offsets = [0, 0], sizes = [8, 32], strides = [1, 1]} : vector<8x128xf32> to vector<8x32xf32>
    %261 = vector.extract_strided_slice %259 {offsets = [0, 32], sizes = [8, 32], strides = [1, 1]} : vector<8x128xf32> to vector<8x32xf32>
    %262 = vector.extract_strided_slice %259 {offsets = [0, 64], sizes = [8, 32], strides = [1, 1]} : vector<8x128xf32> to vector<8x32xf32>
    %263 = vector.extract_strided_slice %259 {offsets = [0, 96], sizes = [8, 32], strides = [1, 1]} : vector<8x128xf32> to vector<8x32xf32>
    %264 = arith.mulf %261, %225 : vector<8x32xf32>
    %265 = arith.mulf %260, %262 : vector<8x32xf32>
    %266 = arith.addf %264, %265 : vector<8x32xf32>
    %267 = math.tanh %266 : vector<8x32xf32>
    %268 = arith.mulf %263, %267 : vector<8x32xf32>
    %c6_i32 = arith.constant 6 : i32
    %c8_i32_64 = arith.constant 8 : i32
    %269 = arith.muli %c6_i32, %c8_i32_64 : i32
    %270 = tpu.assume_multiple %269, 8 : i32
    %271 = arith.index_cast %270 : i32 to index
    %c0_65 = arith.constant 0 : index
    %272 = vector.load %arg10[%271, %c0_65] : memref<64x128xf32, #tpu.memory_space<vmem>>, vector<8x128xf32>
    %cst_66 = arith.constant dense<0.000000e+00> : vector<8x128xf32>
    %273 = tpu.matmul %249, %8, %cst_66 {dimension_numbers = #tpu.dot_dimension_numbers<[1], [0], [0], [1], [0, 0, 1, 1], [], []>} : vector<8x32xf32>, vector<32x128xf32>, vector<8x128xf32> -> vector<8x128xf32>
    %274 = arith.addf %272, %273 : vector<8x128xf32>
    %275 = arith.mulf %274, %21 : vector<8x128xf32>
    %276 = math.tanh %275 : vector<8x128xf32>
    %cst_67 = arith.constant 5.000000e-01 : f32
    %277 = vector.broadcast %cst_67 : f32 to vector<8x128xf32>
    %278 = arith.mulf %277, %276 : vector<8x128xf32>
    %cst_68 = arith.constant 5.000000e-01 : f32
    %279 = vector.broadcast %cst_68 : f32 to vector<8x128xf32>
    %280 = arith.addf %278, %279 : vector<8x128xf32>
    %281 = arith.select %18, %276, %280 : vector<8x128xi1>, vector<8x128xf32>
    %282 = vector.extract_strided_slice %281 {offsets = [0, 0], sizes = [8, 32], strides = [1, 1]} : vector<8x128xf32> to vector<8x32xf32>
    %283 = vector.extract_strided_slice %281 {offsets = [0, 32], sizes = [8, 32], strides = [1, 1]} : vector<8x128xf32> to vector<8x32xf32>
    %284 = vector.extract_strided_slice %281 {offsets = [0, 64], sizes = [8, 32], strides = [1, 1]} : vector<8x128xf32> to vector<8x32xf32>
    %285 = vector.extract_strided_slice %281 {offsets = [0, 96], sizes = [8, 32], strides = [1, 1]} : vector<8x128xf32> to vector<8x32xf32>
    %286 = arith.mulf %283, %247 : vector<8x32xf32>
    %287 = arith.mulf %282, %284 : vector<8x32xf32>
    %288 = arith.addf %286, %287 : vector<8x32xf32>
    %289 = math.tanh %288 : vector<8x32xf32>
    %290 = arith.mulf %285, %289 : vector<8x32xf32>
    %291 = tpu.concatenate %290, %268 in 1 : vector<8x32xf32>, vector<8x32xf32> -> vector<8x64xf32>
    %cst_69 = arith.constant dense<0.000000e+00> : vector<8x128xf32>
    %292 = tpu.matmul %291, %9, %cst_69 {dimension_numbers = #tpu.dot_dimension_numbers<[1], [0], [0], [1], [0, 0, 1, 1], [], []>} : vector<8x64xf32>, vector<64x128xf32>, vector<8x128xf32> -> vector<8x128xf32>
    %293 = arith.addf %292, %12 : vector<8x128xf32>
    %294 = arith.mulf %293, %21 : vector<8x128xf32>
    %295 = math.tanh %294 : vector<8x128xf32>
    %cst_70 = arith.constant 5.000000e-01 : f32
    %296 = vector.broadcast %cst_70 : f32 to vector<8x128xf32>
    %297 = arith.mulf %296, %295 : vector<8x128xf32>
    %cst_71 = arith.constant 5.000000e-01 : f32
    %298 = vector.broadcast %cst_71 : f32 to vector<8x128xf32>
    %299 = arith.addf %297, %298 : vector<8x128xf32>
    %300 = arith.select %18, %295, %299 : vector<8x128xi1>, vector<8x128xf32>
    %301 = vector.extract_strided_slice %300 {offsets = [0, 0], sizes = [8, 32], strides = [1, 1]} : vector<8x128xf32> to vector<8x32xf32>
    %302 = vector.extract_strided_slice %300 {offsets = [0, 32], sizes = [8, 32], strides = [1, 1]} : vector<8x128xf32> to vector<8x32xf32>
    %303 = vector.extract_strided_slice %300 {offsets = [0, 64], sizes = [8, 32], strides = [1, 1]} : vector<8x128xf32> to vector<8x32xf32>
    %304 = vector.extract_strided_slice %300 {offsets = [0, 96], sizes = [8, 32], strides = [1, 1]} : vector<8x128xf32> to vector<8x32xf32>
    %305 = arith.mulf %302, %266 : vector<8x32xf32>
    %306 = arith.mulf %301, %303 : vector<8x32xf32>
    %307 = arith.addf %305, %306 : vector<8x32xf32>
    %308 = math.tanh %307 : vector<8x32xf32>
    %309 = arith.mulf %304, %308 : vector<8x32xf32>
    %c7_i32 = arith.constant 7 : i32
    %c8_i32_72 = arith.constant 8 : i32
    %310 = arith.muli %c7_i32, %c8_i32_72 : i32
    %311 = tpu.assume_multiple %310, 8 : i32
    %312 = arith.index_cast %311 : i32 to index
    %c0_73 = arith.constant 0 : index
    %313 = vector.load %arg10[%312, %c0_73] : memref<64x128xf32, #tpu.memory_space<vmem>>, vector<8x128xf32>
    %cst_74 = arith.constant dense<0.000000e+00> : vector<8x128xf32>
    %314 = tpu.matmul %290, %8, %cst_74 {dimension_numbers = #tpu.dot_dimension_numbers<[1], [0], [0], [1], [0, 0, 1, 1], [], []>} : vector<8x32xf32>, vector<32x128xf32>, vector<8x128xf32> -> vector<8x128xf32>
    %315 = arith.addf %313, %314 : vector<8x128xf32>
    %316 = arith.mulf %315, %21 : vector<8x128xf32>
    %317 = math.tanh %316 : vector<8x128xf32>
    %cst_75 = arith.constant 5.000000e-01 : f32
    %318 = vector.broadcast %cst_75 : f32 to vector<8x128xf32>
    %319 = arith.mulf %318, %317 : vector<8x128xf32>
    %cst_76 = arith.constant 5.000000e-01 : f32
    %320 = vector.broadcast %cst_76 : f32 to vector<8x128xf32>
    %321 = arith.addf %319, %320 : vector<8x128xf32>
    %322 = arith.select %18, %317, %321 : vector<8x128xi1>, vector<8x128xf32>
    %323 = vector.extract_strided_slice %322 {offsets = [0, 0], sizes = [8, 32], strides = [1, 1]} : vector<8x128xf32> to vector<8x32xf32>
    %324 = vector.extract_strided_slice %322 {offsets = [0, 32], sizes = [8, 32], strides = [1, 1]} : vector<8x128xf32> to vector<8x32xf32>
    %325 = vector.extract_strided_slice %322 {offsets = [0, 64], sizes = [8, 32], strides = [1, 1]} : vector<8x128xf32> to vector<8x32xf32>
    %326 = vector.extract_strided_slice %322 {offsets = [0, 96], sizes = [8, 32], strides = [1, 1]} : vector<8x128xf32> to vector<8x32xf32>
    %327 = arith.mulf %324, %288 : vector<8x32xf32>
    %328 = arith.mulf %323, %325 : vector<8x32xf32>
    %329 = arith.addf %327, %328 : vector<8x32xf32>
    %330 = math.tanh %329 : vector<8x32xf32>
    %331 = arith.mulf %326, %330 : vector<8x32xf32>
    %332 = tpu.concatenate %331, %309 in 1 : vector<8x32xf32>, vector<8x32xf32> -> vector<8x64xf32>
    %cst_77 = arith.constant dense<0.000000e+00> : vector<8x128xf32>
    %333 = tpu.matmul %332, %9, %cst_77 {dimension_numbers = #tpu.dot_dimension_numbers<[1], [0], [0], [1], [0, 0, 1, 1], [], []>} : vector<8x64xf32>, vector<64x128xf32>, vector<8x128xf32> -> vector<8x128xf32>
    %334 = arith.addf %333, %12 : vector<8x128xf32>
    %335 = arith.mulf %334, %21 : vector<8x128xf32>
    %336 = math.tanh %335 : vector<8x128xf32>
    %cst_78 = arith.constant 5.000000e-01 : f32
    %337 = vector.broadcast %cst_78 : f32 to vector<8x128xf32>
    %338 = arith.mulf %337, %336 : vector<8x128xf32>
    %cst_79 = arith.constant 5.000000e-01 : f32
    %339 = vector.broadcast %cst_79 : f32 to vector<8x128xf32>
    %340 = arith.addf %338, %339 : vector<8x128xf32>
    %341 = arith.select %18, %336, %340 : vector<8x128xi1>, vector<8x128xf32>
    %342 = vector.extract_strided_slice %341 {offsets = [0, 0], sizes = [8, 32], strides = [1, 1]} : vector<8x128xf32> to vector<8x32xf32>
    %343 = vector.extract_strided_slice %341 {offsets = [0, 32], sizes = [8, 32], strides = [1, 1]} : vector<8x128xf32> to vector<8x32xf32>
    %344 = vector.extract_strided_slice %341 {offsets = [0, 64], sizes = [8, 32], strides = [1, 1]} : vector<8x128xf32> to vector<8x32xf32>
    %345 = vector.extract_strided_slice %341 {offsets = [0, 96], sizes = [8, 32], strides = [1, 1]} : vector<8x128xf32> to vector<8x32xf32>
    %346 = arith.mulf %343, %307 : vector<8x32xf32>
    %347 = arith.mulf %342, %344 : vector<8x32xf32>
    %348 = arith.addf %346, %347 : vector<8x32xf32>
    %349 = math.tanh %348 : vector<8x32xf32>
    %350 = arith.mulf %345, %349 : vector<8x32xf32>
    %c8_i32_80 = arith.constant 8 : i32
    %c0_81 = arith.constant 0 : index
    %c0_82 = arith.constant 0 : index
    %351 = vector.load %arg7[%c0_81, %c0_82] : memref<1x32xf32, #tpu.memory_space<vmem>>, vector<1x32xf32>
    %352 = vector.broadcast %351 : vector<1x32xf32> to vector<8x32xf32>
    %353 = arith.mulf %350, %352 : vector<8x32xf32>
    %cst_83 = arith.constant dense<0.000000e+00> : vector<8xf32>
    %354 = vector.multi_reduction <add>, %353, %cst_83 [1] : vector<8x32xf32> to vector<8xf32>
    %355 = vector.shape_cast %354 : vector<8xf32> to vector<8x1xf32>
    %c0_84 = arith.constant 0 : index
    %c0_85 = arith.constant 0 : index
    %356 = vector.load %arg8[%c0_84, %c0_85] : memref<1x1xf32, #tpu.memory_space<vmem>>, vector<1x1xf32>
    %357 = vector.broadcast %356 : vector<1x1xf32> to vector<8x1xf32>
    %358 = arith.addf %355, %357 : vector<8x1xf32>
    %c0_86 = arith.constant 0 : index
    %c0_87 = arith.constant 0 : index
    %359 = vector.load %arg9[%c0_86, %c0_87] : memref<8x1xf32, #tpu.memory_space<vmem>>, vector<8x1xf32>
    tpu.vector_store %arg9[%c0_86, %c0_87], %358 {strides = array<i32>} : memref<8x1xf32, #tpu.memory_space<vmem>>, vector<8x1xf32>,
    return
  }
  func.func @transform_0(%arg0: i32) -> (i32, i32, i32) {
    %c0_i32 = arith.constant 0 : i32
    %c0_i32_0 = arith.constant 0 : i32
    %c0_i32_1 = arith.constant 0 : i32
    return %c0_i32, %arg0, %c0_i32_0 : i32, i32, i32
  }
  func.func @transform_1(%arg0: i32) -> (i32, i32) {
    %c0_i32 = arith.constant 0 : i32
    %c0_i32_0 = arith.constant 0 : i32
    %c0_i32_1 = arith.constant 0 : i32
    return %c0_i32, %c0_i32_0 : i32, i32
  }
  func.func @transform_2(%arg0: i32) -> (i32, i32) {
    %c0_i32 = arith.constant 0 : i32
    %c0_i32_0 = arith.constant 0 : i32
    %c0_i32_1 = arith.constant 0 : i32
    return %c0_i32, %c0_i32_0 : i32, i32
  }
  func.func @transform_3(%arg0: i32) -> (i32, i32) {
    %c0_i32 = arith.constant 0 : i32
    %c0_i32_0 = arith.constant 0 : i32
    %c0_i32_1 = arith.constant 0 : i32
    return %c0_i32, %c0_i32_0 : i32, i32
  }
  func.func @transform_4(%arg0: i32) -> (i32, i32) {
    %c0_i32 = arith.constant 0 : i32
    %c0_i32_0 = arith.constant 0 : i32
    %c0_i32_1 = arith.constant 0 : i32
    return %c0_i32, %c0_i32_0 : i32, i32
  }
  func.func @transform_5(%arg0: i32) -> (i32, i32) {
    %c0_i32 = arith.constant 0 : i32
    %c0_i32_0 = arith.constant 0 : i32
    %c0_i32_1 = arith.constant 0 : i32
    return %c0_i32, %c0_i32_0 : i32, i32
  }
  func.func @transform_6(%arg0: i32) -> (i32, i32) {
    %c0_i32 = arith.constant 0 : i32
    %c0_i32_0 = arith.constant 0 : i32
    %c0_i32_1 = arith.constant 0 : i32
    return %c0_i32, %c0_i32_0 : i32, i32
  }
  func.func @transform_7(%arg0: i32) -> (i32, i32) {
    %c0_i32 = arith.constant 0 : i32
    %c0_i32_0 = arith.constant 0 : i32
    %c0_i32_1 = arith.constant 0 : i32
    return %c0_i32, %c0_i32_0 : i32, i32
  }
  func.func @transform_8(%arg0: i32) -> (i32, i32) {
    %c0_i32 = arith.constant 0 : i32
    %c0_i32_0 = arith.constant 0 : i32
    return %arg0, %c0_i32 : i32, i32
  }
}

</mosaic_0001>

<bundles_post_ra>
// kernel: lstm_forward_pallas.2
= control target key start
LH: loop header
LB: loop body
LE: loop exit
PB: predicated region body
PF: predicated region fallthrough
CT: control target
= control target key end

     0   :  { %vm110_vm0 = vcmask 1043456   ;;  %v2514_v4 = vmov 0.0|0.0   ;;  %vm85_vm1 = vcmask 31744   ;;  %vm2515_vm2 = vmmov 0   ;;  %s2519_s20 = smov 32   ;;  %s2520_s26 = smov 96   ;;  %s2986_s0 = inlined_call_operand.vmem [shape: f32[4,128], index: 0, kind: input, shape index: {}]   ;;  %s2987_s1 = inlined_call_operand.vmem [shape: f32[32,128], index: 1, kind: input, shape index: {}]   ;;  %s2988_s2 = inlined_call_operand.vmem [shape: f32[1,128], index: 2, kind: input, shape index: {}]   ;;  %s2989_s3 = inlined_call_operand.vmem [shape: f32[64,128], index: 3, kind: input, shape index: {}]   ;;  %s2990_s4 = inlined_call_operand.vmem [shape: f32[1,128], index: 4, kind: input, shape index: {}]   ;;  %s2991_s5 = inlined_call_operand.vmem [shape: f32[1,32], index: 5, kind: input, shape index: {}]   ;;  %s2992_s6 = inlined_call_operand.<no memory space> [shape: f32[1,1], index: 6, kind: input, shape index: {}]   ;;  %s2993_s7 = inlined_call_operand.vmem [shape: f32[8,8,4], index: 7, kind: input, shape index: {}]   ;;  %s2994_s8 = inlined_call_operand.vmem [shape: f32[8,1], index: 8, kind: output, shape index: {}]  }
   0x1   :  { %v13_v0 = vstv %s2992_s6  ;;  %v227_v1 = vld [vmem:[%s2987_s1] sm:$0xff]  ;;  %v228_v2 = vld [vmem:[%s2987_s1 + $0x8] sm:$0xff]  ;;  %2299 = vmatprep.subr.bf16.mxu1 %v2514_v4  ;;  %v229_v8 = vld [vmem:[%s2987_s1 + $0x10] sm:$0xff]  ;;  %v2516_v11 = vmov 0.0   ;;  %v246_v12 = vlaneseq  ;;  %v2517_v19 = vmov 0.5  }
   0x2   :  { %14 = vst [vmem:[#allocation3] sm:$0x1] %v13_v0  ;;  %v77_v3 = vld [vmem:[%s2986_s0] sm:$0xf]  ;;  %v2579_v5 = vpack.c.bf16 %v228_v2, %v227_v1  ;;  %v1889_v7 = vld [vmem:[%s2993_s7 + $0x8] sm:$0xff]  ;;  %v230_v9 = vld [vmem:[%s2987_s1 + $0x18] sm:$0xff]  ;;  %2067 = vmatprep.mubr.msk.f32.mxu1 %vm2515_vm2, %v2516_v11 }
   0x3   :  { %2045 = vmatprep.subr.msk.mxu0 %vm110_vm0, %v77_v3  ;;  %v31_v6 = vld [vmem:[%s2993_s7] sm:$0xff]  ;;  %v2596_v10 = vpack.c.bf16 %v230_v9, %v229_v8  ;;  %v247_v13 = vand.u32 127, %v246_v12  ;;  %v232_v35 = vld [vmem:[%s2989_s3 + $0x8] sm:$0xff]  ;;  %v1890_v36 = vld [vmem:[%s2993_s7 + $0x10] sm:$0xff]  ;;  %vm253_vm6 = vcmask 261120   ;;  %vm355_vm7 = vcmask 523264  }
   0x4   :  { %2046 = vmatpush3.msk.msra.mxu0 %vm110_vm0, %v77_v3  ;;  %2047 = vmatprep.mubr.msk.f32.mxu0 %vm85_vm1, %v31_v6  ;;  %v2612_v15 = vld [vmem:[%s2988_s2] ss:$0 sm:$0xff]  ;;  %s2518_s2 = smov 64   ;;  %v1891_v38 = vld [vmem:[%s2993_s7 + $0x18] sm:$0xff]  ;;  %v233_v39 = vld [vmem:[%s2989_s3 + $0x10] sm:$0xff]  ;;  %vm1883_vm8 = vcmask 7168  }
   0x5   :  { %2301 = vmatpush3.bf16.msra.mxu1 %v2579_v5  ;;  %2048 = vmatmul.mubr.msk.f32.vlgmr.msra.gmra.mrb[0].mxu0 %vm85_vm1, %v1889_v7  ;;  %vm248_vm3 = vcmp.ge.s32.totalorder %v247_v13, 64  ;;  %vm249_vm4 = vcmp.lt.s32.totalorder %v247_v13, 96  ;;  %v231_v34 = vld [vmem:[%s2989_s3] sm:$0xff]  ;;  %v234_v40 = vld [vmem:[%s2989_s3 + $0x18] sm:$0xff]  ;;  %v1893_v43 = vld [vmem:[%s2993_s7 + $0x28] sm:$0xff] }
   0x6   :  { %2302 = vmatprep.subr.bf16.mxu1 %v2514_v4  ;;  %2305 = vmatprep.subr.bf16.mxu0 %v2514_v4  ;;  %vm2615_vm5 = vmand %vm248_vm3, %vm249_vm4  ;;  %v2640_v37 = vpack.c.bf16 %v232_v35, %v231_v34  ;;  %v1892_v41 = vld [vmem:[%s2993_s7 + $0x20] sm:$0xff]  ;;  %v2657_v42 = vpack.c.bf16 %v234_v40, %v233_v39  ;;  %v236_v45 = vld [vmem:[%s2989_s3 + $0x28] sm:$0xff] }
   0x7   :  { %v2621_v20 = vsel %vm2615_vm5, 1.0, %v2517_v19  ;;  %2050 = vmatprep.mubr.msk.f32.mxu0 %vm85_vm1, %v1890_v36  ;;  %v235_v44 = vld [vmem:[%s2989_s3 + $0x20] sm:$0xff]  ;;  %v1894_v46 = vld [vmem:[%s2993_s7 + $0x30] sm:$0xff]  ;;  %v1895_v48 = vld [vmem:[%s2993_s7 + $0x38] sm:$0xff] }
   0x8   :  { %2307 = vmatpush3.bf16.msra.mxu0 %v2640_v37  ;;  %v2677_v47 = vpack.c.bf16 %v236_v45, %v235_v44  ;;  %v237_v49 = vld [vmem:[%s2989_s3 + $0x30] sm:$0xff]  ;;  %v238_v50 = vld [vmem:[%s2989_s3 + $0x38] sm:$0xff]  ;;  %v2737_v63 = vld [vmem:[%s2990_s4] ss:$0 sm:$0xff] }
   0x9   :  { %2304 = vmatpush3.bf16.msra.mxu1 %v2596_v10  ;;  %2051 = vmatmul.mubr.msk.f32.gmra.mrb[2].mxu0 %vm85_vm1, %v1891_v38  ;;  %v2695_v52 = vpack.c.bf16 %v238_v50, %v237_v49 }
   0xa   :  { %2323 = vmatprep.subr.bf16.mxu1 %v2514_v4  ;;  %2053 = vmatprep.mubr.msk.f32.mxu0 %vm85_vm1, %v1892_v41 }
   0xb   :  { %2308 = vmatprep.subr.bf16.mxu0 %v2514_v4 }
   0xc   :  { %2068 = vmatmul.mubr.f32.vlgmr.msra.gmra.mrb[0].mxu1 %v2516_v11  ;;  %2310 = vmatpush3.bf16.msra.mxu0 %v2657_v42 }
   0xd   :  { %2116 = vmatprep.mubr.msk.f32.mxu1 %vm2515_vm2, %v2516_v11  ;;  %2325 = vmatpush3.bf16.msra.mxu1 %v2640_v37 }
   0xe   :  { %2326 = vmatprep.subr.bf16.mxu1 %v2514_v4  ;;  %2054 = vmatmul.mubr.msk.f32.gmra.mrb[4].mxu0 %vm85_vm1, %v1893_v43 }
   0xf   :  { %2056 = vmatprep.mubr.msk.f32.mxu0 %vm85_vm1, %v1894_v46  ;;  %2311 = vmatprep.subr.bf16.mxu0 %v2514_v4 }
  0x10   :  { %2313 = vmatpush3.bf16.msra.mxu0 %v2677_v47 }
  0x11   :  { %2328 = vmatpush3.bf16.msra.mxu1 %v2657_v42  ;;  %2314 = vmatprep.subr.bf16.mxu0 %v2514_v4 }
  0x12   :  { %2329 = vmatprep.subr.bf16.mxu1 %v2514_v4  ;;  %2057 = vmatmul.mubr.msk.f32.gmra.mrb[6].mxu0 %vm85_vm1, %v1895_v48 }
  0x13   :  { %2086 = vmatprep.mubr.msk.f32.mxu0 %vm2515_vm2, %v2516_v11 }
  0x14   :  { %2316 = vmatpush3.bf16.msra.mxu0 %v2695_v52 }
  0x15   :  { %2331 = vmatpush3.bf16.msra.mxu1 %v2677_v47  ;;  %2317 = vmatprep.subr.bf16.mxu0 %v2514_v4 }
  0x16   :  { %2332 = vmatprep.subr.bf16.mxu1 %v2514_v4 }
  0x19   :  { %2334 = vmatpush3.bf16.msra.mxu1 %v2695_v52 }
  0x1a   :  { %2353 = vmatprep.subr.bf16.mxu1 %v2514_v4 }
  0xd8   :  { %v2607_v14 = vpop.f32.mrb[0].mxu0 }
  0xd9   :  { %v180_v16 = vpop.f32.mrb[1].mxu0  ;;  %v186_v6 = vadd.f32 %v2607_v14, %v2612_v15 }
  0xda   :  { %v181_v17 = vadd.f32 %v2612_v15, %v180_v16 }
  0xdc   :  { %v2707_v55 = vpop.f32.mrb[2].mxu0 }
  0xdd   :  { %v2709_v56 = vpop.f32.mrb[3].mxu0 }
  0xde   :  { %v191_v45 = vadd.f32 %v2612_v15, %v2709_v56 }
  0xdf   :  { %v323_v21 = vpop.f32.mrb[0].mxu1 }
  0xe0   :  { %v327_v22 = vadd.f32 %v323_v21, %v181_v17  ;;  %v2069_v23 = vpop.f32.mrb[1].mxu1 }
  0xe1   :  { %v2711_v57 = vpop.f32.mrb[4].mxu0 }
  0xe2   :  { %v328_v24 = vmul.f32 %v327_v22, %v2621_v20  ;;  %v2713_v58 = vpop.f32.mrb[5].mxu0 }
  0xe4   :  { %2450 = vtanh.f32 %v328_v24 }
  0xe5   :  { %v2715_v59 = vpop.f32.mrb[6].mxu0 }
  0xe6   :  { %v2717_v60 = vpop.f32.mrb[7].mxu0 }
  0xee   :  { %v2451_v25 = vpop.eup %2450 }
  0xef   :  { %v330_v26 = vmul.f32 0.5, %v2451_v25 }
  0xf1   :  { %v331_v27 = vadd.f32 0.5, %v330_v26 }
  0xf3   :  { %v332_v28 = vsel %vm2615_vm5, %v2451_v25, %v331_v27 }
  0xf4   :  { %335 = vrot.lane.b32.xlu0 %v332_v28, %s2518_s2  ;;  %v333_v31 = vmul.f32 0.0, %v332_v28 }
 0x166   :  { %v336_v29 = vpop.permute.xlu0 %335 }
 0x167   :  { %v338_v30 = vmul.f32 %v336_v29, %v332_v28 }
 0x169   :  { %340 = vrot.lane.b32.xlu0 %v338_v30, %s2519_s20 }
 0x1db   :  { %v341_v32 = vpop.permute.xlu0 %340 }
 0x1dc   :  { %v2628_v33 = vadd.f32 %v341_v32, %v333_v31 }
 0x1de   :  { %2452 = vtanh.f32 %v2628_v33 }
 0x1e8   :  { %v2453_v51 = vpop.eup %2452 }
 0x1e9   :  { %346 = vrot.lane.b32.xlu1 %v2453_v51, %s2518_s2 }
 0x25b   :  { %v347_v53 = vpop.permute.xlu1 %346 }
 0x25c   :  { %v349_v54 = vmul.f32 %v347_v53, %v332_v28 }
 0x25e   :  { %351 = vrot.lane.b32.xlu1 %v349_v54, %s2519_s20 }
 0x2d0   :  { %v352_v61 = vpop.permute.xlu1 %351 }
 0x2d1   :  { %v354_v62 = vsel %vm253_vm6, %v352_v61, 0.0 }
 0x2d2   :  { %2087 = vmatmul.mubr.msk.f32.vlgmr.msra.gmra.mrb[8].mxu0 %vm355_vm7, %v354_v62 }
 0x2d3   :  { %2319 = vmatpush3.bf16.msra.mxu0 %v2579_v5  ;;  %2097 = vmatprep.mubr.msk.f32.mxu0 %vm2515_vm2, %v2516_v11 }
 0x2d4   :  { %2320 = vmatprep.subr.bf16.mxu0 %v2514_v4 }
 0x2d7   :  { %2322 = vmatpush3.bf16.msra.mxu0 %v2596_v10 }
 0x2d8   :  { %2335 = vmatprep.subr.bf16.mxu0 %v2514_v4 }
 0x2da   :  { %2098 = vmatmul.mubr.msk.f32.vlgmr.msra.gmra.mrb[10].mxu0 %vm253_vm6, %v352_v61 }
 0x2db   :  { %2337 = vmatpush3.bf16.msra.mxu0 %v2579_v5  ;;  %2127 = vmatprep.mubr.msk.f32.mxu0 %vm2515_vm2, %v2516_v11 }
 0x2dc   :  { %2338 = vmatprep.subr.bf16.mxu0 %v2514_v4 }
 0x2df   :  { %2340 = vmatpush3.bf16.msra.mxu0 %v2596_v10 }
 0x2e0   :  { %2341 = vmatprep.subr.bf16.mxu0 %v2514_v4 }
 0x3a5   :  { %v425_v0 = vpop.f32.mrb[8].mxu0 }
 0x3a6   :  { %v426_v1 = vadd.f32 %v2737_v63, %v425_v0  ;;  %v2088_v2 = vpop.f32.mrb[9].mxu0 }
 0x3a8   :  { %v429_v3 = vmul.f32 %v426_v1, %v2621_v20 }
 0x3aa   :  { %2454 = vtanh.f32 %v429_v3 }
 0x3ad   :  { %v521_v7 = vpop.f32.mrb[10].mxu0 }
 0x3ae   :  { %v525_v8 = vadd.f32 %v521_v7, %v186_v6  ;;  %v2099_v9 = vpop.f32.mrb[11].mxu0 }
 0x3b0   :  { %v526_v12 = vmul.f32 %v525_v8, %v2621_v20 }
 0x3b2   :  { %2456 = vtanh.f32 %v526_v12 }
 0x3b4   :  { %v2455_v13 = vpop.eup %2454 }
 0x3b5   :  { %v431_v16 = vmul.f32 0.5, %v2455_v13 }
 0x3b7   :  { %v432_v17 = vadd.f32 0.5, %v431_v16 }
 0x3b9   :  { %v433_v19 = vsel %vm2615_vm5, %v2455_v13, %v432_v17 }
 0x3ba   :  { %436 = vrot.lane.b32.xlu0 %v433_v19, %s2518_s2  ;;  %v434_v28 = vmul.f32 0.0, %v433_v19 }
 0x3bc   :  { %v2457_v21 = vpop.eup %2456 }
 0x3bd   :  { %v528_v22 = vmul.f32 0.5, %v2457_v21 }
 0x3bf   :  { %v529_v23 = vadd.f32 0.5, %v528_v22 }
 0x3c1   :  { %v530_v14 = vsel %vm2615_vm5, %v2457_v21, %v529_v23 }
 0x3c2   :  { %533 = vrot.lane.b32.xlu1 %v530_v14, %s2518_s2  ;;  %v531_v31 = vmul.f32 %v530_v14, %v2628_v33 }
 0x42c   :  { %v437_v24 = vpop.permute.xlu0 %436 }
 0x42d   :  { %v439_v25 = vmul.f32 %v437_v24, %v433_v19 }
 0x42f   :  { %441 = vrot.lane.b32.xlu0 %v439_v25, %s2519_s20 }
 0x434   :  { %v534_v26 = vpop.permute.xlu1 %533 }
 0x435   :  { %v536_v27 = vmul.f32 %v534_v26, %v530_v14 }
 0x437   :  { %538 = vrot.lane.b32.xlu1 %v536_v27, %s2519_s20 }
 0x4a1   :  { %v442_v29 = vpop.permute.xlu0 %441 }
 0x4a2   :  { %v2752_v30 = vadd.f32 %v442_v29, %v434_v28 }
 0x4a4   :  { %2458 = vtanh.f32 %v2752_v30 }
 0x4a9   :  { %v539_v32 = vpop.permute.xlu1 %538 }
 0x4aa   :  { %v541_v34 = vadd.f32 %v539_v32, %v531_v31  ;;  %v196_v32 = vadd.f32 %v2707_v55, %v2612_v15 }
 0x4ac   :  { %2460 = vtanh.f32 %v541_v34 }
 0x4ae   :  { %v2459_v35 = vpop.eup %2458 }
 0x4af   :  { %447 = vrot.lane.b32.xlu0 %v2459_v35, %s2518_s2 }
 0x4b6   :  { %v2461_v36 = vpop.eup %2460 }
 0x4b7   :  { %544 = vrot.lane.b32.xlu1 %v2461_v36, %s2518_s2 }
 0x521   :  { %v448_v38 = vpop.permute.xlu0 %447 }
 0x522   :  { %v450_v39 = vmul.f32 %v448_v38, %v433_v19 }
 0x524   :  { %553 = vrot.lane.b32.xlu1 %v450_v39, %s2518_s2 }
 0x529   :  { %v545_v40 = vpop.permute.xlu1 %544 }
 0x52a   :  { %v547_v41 = vmul.f32 %v545_v40, %v530_v14 }
 0x52c   :  { %549 = vrot.lane.b32.xlu0 %v547_v41, %s2519_s20 }
 0x596   :  { %v554_v43 = vpop.permute.xlu1 %553 }
 0x59e   :  { %v550_v44 = vpop.permute.xlu0 %549 }
 0x59f   :  { %v556_v33 = vsel %vm253_vm6, %v550_v44, %v554_v43  ;;  %2128 = vmatmul.mubr.msk.f32.vlgmr.msra.gmra.mrb[12].mxu0 %vm253_vm6, %v550_v44 }
 0x5a0   :  { %2117 = vmatmul.mubr.msk.f32.vlgmr.msra.gmra.mrb[2].mxu1 %vm355_vm7, %v556_v33  ;;  %2343 = vmatpush3.bf16.msra.mxu0 %v2640_v37 }
 0x5a1   :  { %2344 = vmatprep.subr.bf16.mxu0 %v2514_v4  ;;  %2355 = vmatpush3.bf16.msra.mxu1 %v2579_v5 }
 0x5a2   :  { %2356 = vmatprep.subr.bf16.mxu1 %v2514_v4  ;;  %2157 = vmatprep.mubr.msk.f32.mxu1 %vm2515_vm2, %v2516_v11 }
 0x5a3   :  { %2146 = vmatprep.mubr.msk.f32.mxu0 %vm2515_vm2, %v2516_v11 }
 0x5a4   :  { %2346 = vmatpush3.bf16.msra.mxu0 %v2657_v42 }
 0x5a5   :  { %2347 = vmatprep.subr.bf16.mxu0 %v2514_v4  ;;  %2358 = vmatpush3.bf16.msra.mxu1 %v2596_v10 }
 0x5a6   :  { %2359 = vmatprep.subr.bf16.mxu1 %v2514_v4 }
 0x5a8   :  { %2349 = vmatpush3.bf16.msra.mxu0 %v2677_v47 }
 0x5a9   :  { %2350 = vmatprep.subr.bf16.mxu0 %v2514_v4 }
 0x5ac   :  { %2352 = vmatpush3.bf16.msra.mxu0 %v2695_v52 }
 0x5ad   :  { %2371 = vmatprep.subr.bf16.mxu0 %v2514_v4 }
 0x672   :  { %v722_v46 = vpop.f32.mrb[12].mxu0 }
 0x673   :  { %v726_v48 = vadd.f32 %v722_v46, %v191_v45  ;;  %v626_v49 = vpop.f32.mrb[2].mxu1  ;;  %v2129_v50 = vpop.f32.mrb[13].mxu0 }
 0x674   :  { %v627_v51 = vadd.f32 %v2737_v63, %v626_v49  ;;  %v2118_v53 = vpop.f32.mrb[3].mxu1 }
 0x675   :  { %v727_v54 = vmul.f32 %v726_v48, %v2621_v20 }
 0x676   :  { %v630_v61 = vmul.f32 %v627_v51, %v2621_v20 }
 0x677   :  { %2462 = vtanh.f32 %v727_v54 }
 0x678   :  { %2464 = vtanh.f32 %v630_v61 }
 0x681   :  { %v2463_v62 = vpop.eup %2462 }
 0x682   :  { %v2465_v0 = vpop.eup %2464  ;;  %v729_v1 = vmul.f32 0.5, %v2463_v62 }
 0x683   :  { %v632_v2 = vmul.f32 0.5, %v2465_v0 }
 0x684   :  { %v730_v3 = vadd.f32 0.5, %v729_v1 }
 0x685   :  { %v633_v6 = vadd.f32 0.5, %v632_v2 }
 0x686   :  { %v731_v56 = vsel %vm2615_vm5, %v2463_v62, %v730_v3 }
 0x687   :  { %734 = vrot.lane.b32.xlu1 %v731_v56, %s2518_s2  ;;  %v634_v7 = vsel %vm2615_vm5, %v2465_v0, %v633_v6  ;;  %v732_v16 = vmul.f32 %v731_v56, %v541_v34 }
 0x688   :  { %637 = vrot.lane.b32.xlu0 %v634_v7, %s2518_s2  ;;  %v635_v19 = vmul.f32 %v634_v7, %v2752_v30 }
 0x6f9   :  { %v735_v8 = vpop.permute.xlu1 %734 }
 0x6fa   :  { %v737_v9 = vmul.f32 %v735_v8, %v731_v56  ;;  %v638_v12 = vpop.permute.xlu0 %637 }
 0x6fb   :  { %v640_v13 = vmul.f32 %v638_v12, %v634_v7 }
 0x6fc   :  { %739 = vrot.lane.b32.xlu1 %v737_v9, %s2519_s20 }
 0x6fd   :  { %642 = vrot.lane.b32.xlu0 %v640_v13, %s2519_s20 }
 0x76e   :  { %v740_v17 = vpop.permute.xlu1 %739 }
 0x76f   :  { %v742_v21 = vadd.f32 %v740_v17, %v732_v16  ;;  %v643_v22 = vpop.permute.xlu0 %642 }
 0x770   :  { %v645_v23 = vadd.f32 %v643_v22, %v635_v19 }
 0x771   :  { %2466 = vtanh.f32 %v742_v21 }
 0x772   :  { %2468 = vtanh.f32 %v645_v23 }
 0x77b   :  { %v2467_v14 = vpop.eup %2466 }
 0x77c   :  { %v2469_v24 = vpop.eup %2468  ;;  %745 = vrot.lane.b32.xlu1 %v2467_v14, %s2518_s2 }
 0x77d   :  { %648 = vrot.lane.b32.xlu0 %v2469_v24, %s2518_s2 }
 0x7ee   :  { %v746_v25 = vpop.permute.xlu1 %745 }
 0x7ef   :  { %v748_v26 = vmul.f32 %v746_v25, %v731_v56  ;;  %v649_v27 = vpop.permute.xlu0 %648 }
 0x7f0   :  { %v651_v28 = vmul.f32 %v649_v27, %v634_v7 }
 0x7f1   :  { %750 = vrot.lane.b32.xlu0 %v748_v26, %s2519_s20 }
 0x7f2   :  { %754 = vrot.lane.b32.xlu1 %v651_v28, %s2518_s2 }
 0x863   :  { %v751_v29 = vpop.permute.xlu0 %750 }
 0x864   :  { %2158 = vmatmul.mubr.msk.f32.vlgmr.msra.gmra.mrb[4].mxu1 %vm253_vm6, %v751_v29  ;;  %v755_v30 = vpop.permute.xlu1 %754 }
 0x865   :  { %v757_v31 = vsel %vm253_vm6, %v751_v29, %v755_v30  ;;  %2361 = vmatpush3.bf16.msra.mxu1 %v2640_v37  ;;  %2176 = vmatprep.mubr.msk.f32.mxu1 %vm2515_vm2, %v2516_v11 }
 0x866   :  { %2147 = vmatmul.mubr.msk.f32.vlgmr.msra.gmra.mrb[14].mxu0 %vm355_vm7, %v757_v31  ;;  %2362 = vmatprep.subr.bf16.mxu1 %v2514_v4 }
 0x867   :  { %2373 = vmatpush3.bf16.msra.mxu0 %v2579_v5  ;;  %2187 = vmatprep.mubr.msk.f32.mxu0 %vm2515_vm2, %v2516_v11 }
 0x868   :  { %2374 = vmatprep.subr.bf16.mxu0 %v2514_v4 }
 0x869   :  { %2364 = vmatpush3.bf16.msra.mxu1 %v2657_v42 }
 0x86a   :  { %2365 = vmatprep.subr.bf16.mxu1 %v2514_v4 }
 0x86b   :  { %2376 = vmatpush3.bf16.msra.mxu0 %v2596_v10 }
 0x86c   :  { %2377 = vmatprep.subr.bf16.mxu0 %v2514_v4 }
 0x86d   :  { %2367 = vmatpush3.bf16.msra.mxu1 %v2677_v47 }
 0x86e   :  { %2368 = vmatprep.subr.bf16.mxu1 %v2514_v4 }
 0x871   :  { %2370 = vmatpush3.bf16.msra.mxu1 %v2695_v52 }
 0x872   :  { %2389 = vmatprep.subr.bf16.mxu1 %v2514_v4 }
 0x937   :  { %v923_v34 = vpop.f32.mrb[4].mxu1 }
 0x938   :  { %v927_v35 = vadd.f32 %v923_v34, %v196_v32  ;;  %v2159_v36 = vpop.f32.mrb[5].mxu1 }
 0x939   :  { %v827_v38 = vpop.f32.mrb[14].mxu0 }
 0x93a   :  { %v928_v39 = vmul.f32 %v927_v35, %v2621_v20  ;;  %v828_v40 = vadd.f32 %v2737_v63, %v827_v38  ;;  %v2148_v41 = vpop.f32.mrb[15].mxu0 }
 0x93c   :  { %2470 = vtanh.f32 %v928_v39  ;;  %v831_v43 = vmul.f32 %v828_v40, %v2621_v20 }
 0x93e   :  { %2472 = vtanh.f32 %v831_v43 }
 0x946   :  { %v2471_v44 = vpop.eup %2470 }
 0x947   :  { %v930_v33 = vmul.f32 0.5, %v2471_v44 }
 0x948   :  { %v2473_v45 = vpop.eup %2472 }
 0x949   :  { %v931_v46 = vadd.f32 0.5, %v930_v33  ;;  %v833_v48 = vmul.f32 0.5, %v2473_v45 }
 0x94b   :  { %v932_v55 = vsel %vm2615_vm5, %v2471_v44, %v931_v46  ;;  %v834_v49 = vadd.f32 0.5, %v833_v48 }
 0x94c   :  { %935 = vrot.lane.b32.xlu1 %v932_v55, %s2518_s2  ;;  %v933_v62 = vmul.f32 %v932_v55, %v742_v21  ;;  %v201_v21 = vadd.f32 %v2612_v15, %v2713_v58 }
 0x94d   :  { %v835_v50 = vsel %vm2615_vm5, %v2473_v45, %v834_v49 }
 0x94e   :  { %838 = vrot.lane.b32.xlu0 %v835_v50, %s2518_s2  ;;  %v836_v2 = vmul.f32 %v835_v50, %v645_v23 }
 0x9be   :  { %v936_v51 = vpop.permute.xlu1 %935 }
 0x9bf   :  { %v938_v53 = vmul.f32 %v936_v51, %v932_v55 }
 0x9c0   :  { %v839_v54 = vpop.permute.xlu0 %838 }
 0x9c1   :  { %v841_v61 = vmul.f32 %v839_v54, %v835_v50  ;;  %940 = vrot.lane.b32.xlu1 %v938_v53, %s2519_s20 }
 0x9c3   :  { %843 = vrot.lane.b32.xlu0 %v841_v61, %s2519_s20 }
 0xa33   :  { %v941_v0 = vpop.permute.xlu1 %940 }
 0xa34   :  { %v943_v1 = vadd.f32 %v941_v0, %v933_v62 }
 0xa35   :  { %v844_v3 = vpop.permute.xlu0 %843 }
 0xa36   :  { %2474 = vtanh.f32 %v943_v1  ;;  %v846_v6 = vadd.f32 %v844_v3, %v836_v2 }
 0xa38   :  { %2476 = vtanh.f32 %v846_v6 }
 0xa40   :  { %v2475_v56 = vpop.eup %2474 }
 0xa41   :  { %946 = vrot.lane.b32.xlu1 %v2475_v56, %s2518_s2 }
 0xa42   :  { %v2477_v7 = vpop.eup %2476 }
 0xa43   :  { %849 = vrot.lane.b32.xlu0 %v2477_v7, %s2518_s2 }
 0xab3   :  { %v947_v8 = vpop.permute.xlu1 %946 }
 0xab4   :  { %v949_v9 = vmul.f32 %v947_v8, %v932_v55 }
 0xab5   :  { %v850_v12 = vpop.permute.xlu0 %849 }
 0xab6   :  { %v852_v13 = vmul.f32 %v850_v12, %v835_v50  ;;  %951 = vrot.lane.b32.xlu0 %v949_v9, %s2519_s20 }
 0xab8   :  { %955 = vrot.lane.b32.xlu1 %v852_v13, %s2518_s2 }
 0xb28   :  { %v952_v16 = vpop.permute.xlu0 %951 }
 0xb29   :  { %2188 = vmatmul.mubr.msk.f32.vlgmr.msra.gmra.mrb[16].mxu0 %vm253_vm6, %v952_v16 }
 0xb2a   :  { %v956_v17 = vpop.permute.xlu1 %955  ;;  %2379 = vmatpush3.bf16.msra.mxu0 %v2640_v37  ;;  %2206 = vmatprep.mubr.msk.f32.mxu0 %vm2515_vm2, %v2516_v11 }
 0xb2b   :  { %v958_v19 = vsel %vm253_vm6, %v952_v16, %v956_v17  ;;  %2380 = vmatprep.subr.bf16.mxu0 %v2514_v4 }
 0xb2c   :  { %2177 = vmatmul.mubr.msk.f32.vlgmr.msra.gmra.mrb[6].mxu1 %vm355_vm7, %v958_v19 }
 0xb2d   :  { %2391 = vmatpush3.bf16.msra.mxu1 %v2579_v5  ;;  %2217 = vmatprep.mubr.msk.f32.mxu1 %vm2515_vm2, %v2516_v11 }
 0xb2e   :  { %2382 = vmatpush3.bf16.msra.mxu0 %v2657_v42  ;;  %2392 = vmatprep.subr.bf16.mxu1 %v2514_v4 }
 0xb2f   :  { %2383 = vmatprep.subr.bf16.mxu0 %v2514_v4 }
 0xb31   :  { %2394 = vmatpush3.bf16.msra.mxu1 %v2596_v10 }
 0xb32   :  { %2385 = vmatpush3.bf16.msra.mxu0 %v2677_v47  ;;  %2395 = vmatprep.subr.bf16.mxu1 %v2514_v4 }
 0xb33   :  { %2386 = vmatprep.subr.bf16.mxu0 %v2514_v4 }
 0xb36   :  { %2388 = vmatpush3.bf16.msra.mxu0 %v2695_v52 }
 0xb37   :  { %2407 = vmatprep.subr.bf16.mxu0 %v2514_v4 }
 0xbfc   :  { %v1124_v22 = vpop.f32.mrb[16].mxu0 }
 0xbfd   :  { %v1128_v23 = vadd.f32 %v1124_v22, %v201_v21  ;;  %v2189_v14 = vpop.f32.mrb[17].mxu0 }
 0xbff   :  { %v1129_v24 = vmul.f32 %v1128_v23, %v2621_v20  ;;  %v1028_v25 = vpop.f32.mrb[6].mxu1 }
 0xc00   :  { %v1029_v26 = vadd.f32 %v2737_v63, %v1028_v25  ;;  %v2178_v27 = vpop.f32.mrb[7].mxu1 }
 0xc01   :  { %2478 = vtanh.f32 %v1129_v24 }
 0xc02   :  { %v1032_v28 = vmul.f32 %v1029_v26, %v2621_v20 }
 0xc04   :  { %2480 = vtanh.f32 %v1032_v28 }
 0xc0b   :  { %v2479_v29 = vpop.eup %2478 }
 0xc0c   :  { %v1131_v30 = vmul.f32 0.5, %v2479_v29 }
 0xc0e   :  { %v2481_v31 = vpop.eup %2480  ;;  %v1132_v32 = vadd.f32 0.5, %v1131_v30 }
 0xc0f   :  { %v1034_v34 = vmul.f32 0.5, %v2481_v31 }
 0xc10   :  { %v1133_v58 = vsel %vm2615_vm5, %v2479_v29, %v1132_v32 }
 0xc11   :  { %1136 = vrot.lane.b32.xlu1 %v1133_v58, %s2518_s2  ;;  %v1035_v35 = vadd.f32 0.5, %v1034_v34  ;;  %v1134_v43 = vmul.f32 %v1133_v58, %v943_v1  ;;  %v206_v1 = vadd.f32 %v2711_v57, %v2612_v15 }
 0xc13   :  { %v1036_v36 = vsel %vm2615_vm5, %v2481_v31, %v1035_v35 }
 0xc14   :  { %1039 = vrot.lane.b32.xlu0 %v1036_v36, %s2518_s2  ;;  %v1037_v45 = vmul.f32 %v1036_v36, %v846_v6 }
 0xc83   :  { %v1137_v38 = vpop.permute.xlu1 %1136 }
 0xc84   :  { %v1139_v39 = vmul.f32 %v1137_v38, %v1133_v58 }
 0xc86   :  { %v1040_v40 = vpop.permute.xlu0 %1039  ;;  %1141 = vrot.lane.b32.xlu1 %v1139_v39, %s2519_s20 }
 0xc87   :  { %v1042_v41 = vmul.f32 %v1040_v40, %v1036_v36 }
 0xc89   :  { %1044 = vrot.lane.b32.xlu0 %v1042_v41, %s2519_s20 }
 0xcf8   :  { %v1142_v44 = vpop.permute.xlu1 %1141 }
 0xcf9   :  { %v1144_v33 = vadd.f32 %v1142_v44, %v1134_v43 }
 0xcfb   :  { %2482 = vtanh.f32 %v1144_v33  ;;  %v1045_v46 = vpop.permute.xlu0 %1044 }
 0xcfc   :  { %v1047_v48 = vadd.f32 %v1045_v46, %v1037_v45 }
 0xcfe   :  { %2484 = vtanh.f32 %v1047_v48 }
 0xd05   :  { %v2483_v55 = vpop.eup %2482 }
 0xd06   :  { %1147 = vrot.lane.b32.xlu1 %v2483_v55, %s2518_s2 }
 0xd08   :  { %v2485_v49 = vpop.eup %2484 }
 0xd09   :  { %1050 = vrot.lane.b32.xlu0 %v2485_v49, %s2518_s2 }
 0xd78   :  { %v1148_v50 = vpop.permute.xlu1 %1147 }
 0xd79   :  { %v1150_v51 = vmul.f32 %v1148_v50, %v1133_v58 }
 0xd7b   :  { %v1051_v53 = vpop.permute.xlu0 %1050  ;;  %1152 = vrot.lane.b32.xlu0 %v1150_v51, %s2519_s20 }
 0xd7c   :  { %v1053_v54 = vmul.f32 %v1051_v53, %v1036_v36 }
 0xd7e   :  { %1156 = vrot.lane.b32.xlu1 %v1053_v54, %s2518_s2 }
 0xded   :  { %v1153_v61 = vpop.permute.xlu0 %1152 }
 0xdee   :  { %2218 = vmatmul.mubr.msk.f32.vlgmr.msra.gmra.mrb[8].mxu1 %vm253_vm6, %v1153_v61 }
 0xdef   :  { %2397 = vmatpush3.bf16.msra.mxu1 %v2640_v37  ;;  %2236 = vmatprep.mubr.msk.f32.mxu1 %vm2515_vm2, %v2516_v11 }
 0xdf0   :  { %v1157_v62 = vpop.permute.xlu1 %1156  ;;  %2398 = vmatprep.subr.bf16.mxu1 %v2514_v4 }
 0xdf1   :  { %v1159_v0 = vsel %vm253_vm6, %v1153_v61, %v1157_v62 }
 0xdf2   :  { %2207 = vmatmul.mubr.msk.f32.vlgmr.msra.gmra.mrb[18].mxu0 %vm355_vm7, %v1159_v0 }
 0xdf3   :  { %2409 = vmatpush3.bf16.msra.mxu0 %v2579_v5  ;;  %2400 = vmatpush3.bf16.msra.mxu1 %v2657_v42 }
 0xdf4   :  { %2410 = vmatprep.subr.bf16.mxu0 %v2514_v4  ;;  %2401 = vmatprep.subr.bf16.mxu1 %v2514_v4 }
 0xdf5   :  { %2247 = vmatprep.mubr.msk.f32.mxu0 %vm2515_vm2, %v2516_v11 }
 0xdf7   :  { %2412 = vmatpush3.bf16.msra.mxu0 %v2596_v10  ;;  %2403 = vmatpush3.bf16.msra.mxu1 %v2677_v47 }
 0xdf8   :  { %2404 = vmatprep.subr.bf16.mxu1 %v2514_v4  ;;  %2413 = vmatprep.subr.bf16.mxu0 %v2514_v4 }
 0xdfb   :  { %2406 = vmatpush3.bf16.msra.mxu1 %v2695_v52 }
 0xdfc   :  { %2425 = vmatprep.subr.bf16.mxu1 %v2514_v4 }
 0xec1   :  { %v1325_v2 = vpop.f32.mrb[8].mxu1 }
 0xec2   :  { %v1329_v3 = vadd.f32 %v1325_v2, %v206_v1  ;;  %v2219_v6 = vpop.f32.mrb[9].mxu1 }
 0xec4   :  { %v1330_v56 = vmul.f32 %v1329_v3, %v2621_v20 }
 0xec5   :  { %v1229_v7 = vpop.f32.mrb[18].mxu0 }
 0xec6   :  { %2486 = vtanh.f32 %v1330_v56  ;;  %v1230_v8 = vadd.f32 %v2737_v63, %v1229_v7  ;;  %v2208_v9 = vpop.f32.mrb[19].mxu0 }
 0xec8   :  { %v1233_v12 = vmul.f32 %v1230_v8, %v2621_v20 }
 0xeca   :  { %2488 = vtanh.f32 %v1233_v12 }
 0xed0   :  { %v2487_v13 = vpop.eup %2486 }
 0xed1   :  { %v1332_v16 = vmul.f32 0.5, %v2487_v13 }
 0xed3   :  { %v1333_v17 = vadd.f32 0.5, %v1332_v16 }
 0xed4   :  { %v2489_v19 = vpop.eup %2488 }
 0xed5   :  { %v1334_v57 = vsel %vm2615_vm5, %v2487_v13, %v1333_v17  ;;  %v1235_v21 = vmul.f32 0.5, %v2489_v19 }
 0xed6   :  { %1337 = vrot.lane.b32.xlu1 %v1334_v57, %s2518_s2  ;;  %v1335_v27 = vmul.f32 %v1334_v57, %v1144_v33 }
 0xed7   :  { %v1236_v22 = vadd.f32 0.5, %v1235_v21 }
 0xed9   :  { %v1237_v23 = vsel %vm2615_vm5, %v2489_v19, %v1236_v22 }
 0xeda   :  { %1240 = vrot.lane.b32.xlu0 %v1237_v23, %s2518_s2  ;;  %v1238_v30 = vmul.f32 %v1237_v23, %v1047_v48 }
 0xf48   :  { %v1338_v14 = vpop.permute.xlu1 %1337 }
 0xf49   :  { %v1340_v24 = vmul.f32 %v1338_v14, %v1334_v57 }
 0xf4b   :  { %1342 = vrot.lane.b32.xlu1 %v1340_v24, %s2519_s20 }
 0xf4c   :  { %v1241_v25 = vpop.permute.xlu0 %1240 }
 0xf4d   :  { %v1243_v26 = vmul.f32 %v1241_v25, %v1237_v23 }
 0xf4f   :  { %1245 = vrot.lane.b32.xlu0 %v1243_v26, %s2519_s20 }
 0xfbd   :  { %v1343_v28 = vpop.permute.xlu1 %1342 }
 0xfbe   :  { %v1345_v29 = vadd.f32 %v1343_v28, %v1335_v27 }
 0xfc0   :  { %2490 = vtanh.f32 %v1345_v29 }
 0xfc1   :  { %v1246_v31 = vpop.permute.xlu0 %1245 }
 0xfc2   :  { %v1248_v32 = vadd.f32 %v1246_v31, %v1238_v30 }
 0xfc4   :  { %2492 = vtanh.f32 %v1248_v32 }
 0xfca   :  { %v2491_v34 = vpop.eup %2490 }
 0xfcb   :  { %1348 = vrot.lane.b32.xlu1 %v2491_v34, %s2518_s2 }
 0xfce   :  { %v2493_v58 = vpop.eup %2492 }
 0xfcf   :  { %1251 = vrot.lane.b32.xlu0 %v2493_v58, %s2518_s2 }
0x103d   :  { %v1349_v35 = vpop.permute.xlu1 %1348 }
0x103e   :  { %v1351_v36 = vmul.f32 %v1349_v35, %v1334_v57 }
0x1040   :  { %1353 = vrot.lane.b32.xlu0 %v1351_v36, %s2519_s20 }
0x1041   :  { %v1252_v38 = vpop.permute.xlu0 %1251 }
0x1042   :  { %v1254_v39 = vmul.f32 %v1252_v38, %v1237_v23 }
0x1044   :  { %1357 = vrot.lane.b32.xlu1 %v1254_v39, %s2518_s2 }
0x10b2   :  { %v1354_v40 = vpop.permute.xlu0 %1353 }
0x10b3   :  { %2248 = vmatmul.mubr.msk.f32.vlgmr.msra.gmra.mrb[20].mxu0 %vm253_vm6, %v1354_v40 }
0x10b4   :  { %2415 = vmatpush3.bf16.msra.mxu0 %v2640_v37  ;;  %2266 = vmatprep.mubr.msk.f32.mxu0 %vm2515_vm2, %v2516_v11 }
0x10b5   :  { %2416 = vmatprep.subr.bf16.mxu0 %v2514_v4 }
0x10b6   :  { %v1358_v41 = vpop.permute.xlu1 %1357 }
0x10b7   :  { %v1360_v43 = vsel %vm253_vm6, %v1354_v40, %v1358_v41 }
0x10b8   :  { %2237 = vmatmul.mubr.msk.f32.vlgmr.msra.gmra.mrb[10].mxu1 %vm355_vm7, %v1360_v43  ;;  %2418 = vmatpush3.bf16.msra.mxu0 %v2657_v42 }
0x10b9   :  { %2427 = vmatpush3.bf16.msra.mxu1 %v2579_v5  ;;  %2419 = vmatprep.subr.bf16.mxu0 %v2514_v4  ;;  %v211_v5 = vadd.f32 %v2612_v15, %v2717_v60 }
0x10ba   :  { %2428 = vmatprep.subr.bf16.mxu1 %v2514_v4  ;;  %2277 = vmatprep.mubr.msk.f32.mxu1 %vm2515_vm2, %v2516_v11 }
0x10bc   :  { %2421 = vmatpush3.bf16.msra.mxu0 %v2677_v47 }
0x10bd   :  { %2430 = vmatpush3.bf16.msra.mxu1 %v2596_v10  ;;  %2422 = vmatprep.subr.bf16.mxu0 %v2514_v4 }
0x10be   :  { %2431 = vmatprep.subr.bf16.mxu1 %v2514_v4 }
0x10c0   :  { %2424 = vmatpush3.bf16.msra.mxu0 %v2695_v52 }
0x1186   :  { %v1526_v44 = vpop.f32.mrb[20].mxu0 }
0x1187   :  { %v1530_v33 = vadd.f32 %v1526_v44, %v211_v5  ;;  %v2249_v45 = vpop.f32.mrb[21].mxu0 }
0x1189   :  { %v1531_v46 = vmul.f32 %v1530_v33, %v2621_v20 }
0x118b   :  { %2494 = vtanh.f32 %v1531_v46  ;;  %v1430_v48 = vpop.f32.mrb[10].mxu1 }
0x118c   :  { %v1431_v55 = vadd.f32 %v2737_v63, %v1430_v48  ;;  %v2238_v49 = vpop.f32.mrb[11].mxu1 }
0x118e   :  { %v1434_v10 = vmul.f32 %v1431_v55, %v2621_v20 }
0x1190   :  { %2496 = vtanh.f32 %v1434_v10 }
0x1195   :  { %v2495_v50 = vpop.eup %2494 }
0x1196   :  { %v1533_v51 = vmul.f32 0.5, %v2495_v50 }
0x1198   :  { %v1534_v53 = vadd.f32 0.5, %v1533_v51 }
0x119a   :  { %v2497_v54 = vpop.eup %2496  ;;  %v1535_v60 = vsel %vm2615_vm5, %v2495_v50, %v1534_v53 }
0x119b   :  { %1538 = vrot.lane.b32.xlu1 %v1535_v60, %s2518_s2  ;;  %v1436_v61 = vmul.f32 0.5, %v2497_v54  ;;  %v1536_v56 = vmul.f32 %v1535_v60, %v1345_v29 }
0x119d   :  { %v1437_v62 = vadd.f32 0.5, %v1436_v61 }
0x119f   :  { %v1438_v0 = vsel %vm2615_vm5, %v2497_v54, %v1437_v62 }
0x11a0   :  { %1441 = vrot.lane.b32.xlu0 %v1438_v0, %s2518_s2  ;;  %v1439_v9 = vmul.f32 %v1438_v0, %v1248_v32 }
0x120d   :  { %v1539_v1 = vpop.permute.xlu1 %1538 }
0x120e   :  { %v1541_v2 = vmul.f32 %v1539_v1, %v1535_v60 }
0x1210   :  { %1543 = vrot.lane.b32.xlu1 %v1541_v2, %s2519_s20 }
0x1212   :  { %v1442_v3 = vpop.permute.xlu0 %1441 }
0x1213   :  { %v1444_v6 = vmul.f32 %v1442_v3, %v1438_v0 }
0x1215   :  { %1446 = vrot.lane.b32.xlu0 %v1444_v6, %s2519_s20 }
0x1282   :  { %v1544_v7 = vpop.permute.xlu1 %1543 }
0x1283   :  { %v1546_v8 = vadd.f32 %v1544_v7, %v1536_v56 }
0x1285   :  { %2498 = vtanh.f32 %v1546_v8 }
0x1287   :  { %v1447_v12 = vpop.permute.xlu0 %1446 }
0x1288   :  { %v1449_v13 = vadd.f32 %v1447_v12, %v1439_v9 }
0x128a   :  { %2500 = vtanh.f32 %v1449_v13 }
0x128f   :  { %v2499_v16 = vpop.eup %2498 }
0x1290   :  { %1549 = vrot.lane.b32.xlu1 %v2499_v16, %s2518_s2 }
0x1294   :  { %v2501_v17 = vpop.eup %2500 }
0x1295   :  { %1452 = vrot.lane.b32.xlu0 %v2501_v17, %s2518_s2 }
0x1302   :  { %v1550_v19 = vpop.permute.xlu1 %1549 }
0x1303   :  { %v1552_v57 = vmul.f32 %v1550_v19, %v1535_v60  ;;  %v1923_v19 = vld [vmem:[#allocation3] ss:$0 sm:$0xff] }
0x1305   :  { %1554 = vrot.lane.b32.xlu0 %v1552_v57, %s2519_s20 }
0x1307   :  { %v1453_v21 = vpop.permute.xlu0 %1452 }
0x1308   :  { %v1455_v22 = vmul.f32 %v1453_v21, %v1438_v0 }
0x130a   :  { %1558 = vrot.lane.b32.xlu1 %v1455_v22, %s2518_s2 }
0x1377   :  { %v1555_v23 = vpop.permute.xlu0 %1554 }
0x1378   :  { %2278 = vmatmul.mubr.msk.f32.vlgmr.msra.gmra.mrb[12].mxu1 %vm253_vm6, %v1555_v23 }
0x1379   :  { %2433 = vmatpush3.bf16.msra.mxu1 %v2640_v37  ;;  %2296 = vmatprep.mubr.msk.f32.mxu1 %vm2515_vm2, %v2516_v11  ;;  %v216_v11 = vadd.f32 %v2715_v59, %v2612_v15 }
0x137a   :  { %2434 = vmatprep.subr.bf16.mxu1 %v2514_v4 }
0x137c   :  { %v1559_v14 = vpop.permute.xlu1 %1558 }
0x137d   :  { %v1561_v24 = vsel %vm253_vm6, %v1555_v23, %v1559_v14  ;;  %2436 = vmatpush3.bf16.msra.mxu1 %v2657_v42 }
0x137e   :  { %2267 = vmatmul.mubr.msk.f32.vlgmr.msra.gmra.mrb[22].mxu0 %vm355_vm7, %v1561_v24  ;;  %2437 = vmatprep.subr.bf16.mxu1 %v2514_v4 }
0x1381   :  { %2439 = vmatpush3.bf16.msra.mxu1 %v2677_v47 }
0x1382   :  { %2440 = vmatprep.subr.bf16.mxu1 %v2514_v4 }
0x1385   :  { %2442 = vmatpush3.bf16.msra.mxu1 %v2695_v52 }
0x144b   :  { %v1727_v37 = vpop.f32.mrb[12].mxu1 }
0x144c   :  { %v1731_v25 = vadd.f32 %v1727_v37, %v216_v11  ;;  %v2279_v26 = vpop.f32.mrb[13].mxu1 }
0x144e   :  { %v1732_v27 = vmul.f32 %v1731_v25, %v2621_v20 }
0x1450   :  { %2502 = vtanh.f32 %v1732_v27 }
0x1451   :  { %v1631_v42 = vpop.f32.mrb[22].mxu0 }
0x1452   :  { %v1632_v28 = vadd.f32 %v2737_v63, %v1631_v42  ;;  %v2268_v29 = vpop.f32.mrb[23].mxu0 }
0x1454   :  { %v1635_v30 = vmul.f32 %v1632_v28, %v2621_v20 }
0x1456   :  { %2504 = vtanh.f32 %v1635_v30 }
0x145a   :  { %v2503_v47 = vpop.eup %2502 }
0x145b   :  { %v1734_v4 = vmul.f32 0.5, %v2503_v47 }
0x145d   :  { %v1735_v31 = vadd.f32 0.5, %v1734_v4 }
0x145f   :  { %v1736_v52 = vsel %vm2615_vm5, %v2503_v47, %v1735_v31 }
0x1460   :  { %v2505_v15 = vpop.eup %2504  ;;  %1739 = vrot.lane.b32.xlu1 %v1736_v52, %s2518_s2  ;;  %v1737_v39 = vmul.f32 %v1736_v52, %v1546_v8 }
0x1461   :  { %v1637_v59 = vmul.f32 0.5, %v2505_v15 }
0x1463   :  { %v1638_v32 = vadd.f32 0.5, %v1637_v59 }
0x1465   :  { %v1639_v34 = vsel %vm2615_vm5, %v2505_v15, %v1638_v32 }
0x1466   :  { %1642 = vrot.lane.b32.xlu0 %v1639_v34, %s2518_s2  ;;  %v1640_v43 = vmul.f32 %v1639_v34, %v1449_v13 }
0x14d2   :  { %v1740_v58 = vpop.permute.xlu1 %1739 }
0x14d3   :  { %v1742_v35 = vmul.f32 %v1740_v58, %v1736_v52 }
0x14d5   :  { %1744 = vrot.lane.b32.xlu1 %v1742_v35, %s2519_s20 }
0x14d8   :  { %v1643_v36 = vpop.permute.xlu0 %1642 }
0x14d9   :  { %v1645_v38 = vmul.f32 %v1643_v36, %v1639_v34 }
0x14db   :  { %1647 = vrot.lane.b32.xlu0 %v1645_v38, %s2519_s20 }
0x1547   :  { %v1745_v40 = vpop.permute.xlu1 %1744 }
0x1548   :  { %v1747_v41 = vadd.f32 %v1745_v40, %v1737_v39 }
0x154a   :  { %2506 = vtanh.f32 %v1747_v41 }
0x154d   :  { %v1648_v5 = vpop.permute.xlu0 %1647 }
0x154e   :  { %v1650_v44 = vadd.f32 %v1648_v5, %v1640_v43 }
0x1550   :  { %2508 = vtanh.f32 %v1650_v44 }
0x1554   :  { %v2507_v33 = vpop.eup %2506 }
0x1555   :  { %1750 = vrot.lane.b32.xlu1 %v2507_v33, %s2518_s2 }
0x155a   :  { %v2509_v45 = vpop.eup %2508 }
0x155b   :  { %1653 = vrot.lane.b32.xlu0 %v2509_v45, %s2518_s2 }
0x15c7   :  { %v1751_v46 = vpop.permute.xlu1 %1750 }
0x15c8   :  { %v1753_v48 = vmul.f32 %v1751_v46, %v1736_v52 }
0x15ca   :  { %1755 = vrot.lane.b32.xlu0 %v1753_v48, %s2519_s20 }
0x15cd   :  { %v1654_v55 = vpop.permute.xlu0 %1653 }
0x15ce   :  { %v1656_v49 = vmul.f32 %v1654_v55, %v1639_v34 }
0x15d0   :  { %1759 = vrot.lane.b32.xlu1 %v1656_v49, %s2518_s2 }
0x163c   :  { %v1756_v10 = vpop.permute.xlu0 %1755 }
0x1642   :  { %v1760_v50 = vpop.permute.xlu1 %1759 }
0x1643   :  { %v1762_v51 = vsel %vm253_vm6, %v1756_v10, %v1760_v50 }
0x1644   :  { %2297 = vmatmul.mubr.msk.f32.vlgmr.msra.gmra.mrb[14].mxu1 %vm355_vm7, %v1762_v51 }
0x1717   :  { %v1832_v53 = vpop.f32.mrb[14].mxu1 }
0x1718   :  { %v1833_v54 = vadd.f32 %v2737_v63, %v1832_v53  ;;  %v2298_v60 = vpop.f32.mrb[15].mxu1  ;;  %v1922_v63 = vld [vmem:[%s2991_s5] ss:$0 sm:$0xff] }
0x171a   :  { %v1836_v61 = vmul.f32 %v1833_v54, %v2621_v20 }
0x171c   :  { %2510 = vtanh.f32 %v1836_v61 }
0x1726   :  { %v2511_v62 = vpop.eup %2510 }
0x1727   :  { %v1838_v0 = vmul.f32 0.5, %v2511_v62 }
0x1729   :  { %v1839_v1 = vadd.f32 0.5, %v1838_v0 }
0x172b   :  { %v1840_v2 = vsel %vm2615_vm5, %v2511_v62, %v1839_v1 }
0x172c   :  { %1843 = vrot.lane.b32.xlu0 %v1840_v2, %s2518_s2  ;;  %v1841_v20 = vmul.f32 %v1840_v2, %v1650_v44 }
0x179e   :  { %v1844_v3 = vpop.permute.xlu0 %1843 }
0x179f   :  { %v1846_v6 = vmul.f32 %v1844_v3, %v1840_v2 }
0x17a1   :  { %1848 = vrot.lane.b32.xlu1 %v1846_v6, %s2519_s20 }
0x17a5   :  { %1864 = vrot.lane.b32.xlu1 %v1922_v63, %s2520_s26 }
0x1813   :  { %v1849_v56 = vpop.permute.xlu1 %1848 }
0x1814   :  { %v1851_v7 = vadd.f32 %v1849_v56, %v1841_v20 }
0x1816   :  { %2512 = vtanh.f32 %v1851_v7 }
0x1817   :  { %v1865_v9 = vpop.permute.xlu1 %1864 }
0x1820   :  { %v2513_v8 = vpop.eup %2512 }
0x1821   :  { %1854 = vrot.lane.b32.xlu0 %v2513_v8, %s2518_s2 }
0x1893   :  { %v1855_v18 = vpop.permute.xlu0 %1854 }
0x1894   :  { %v1857_v12 = vmul.f32 %v1855_v18, %v1840_v2 }
0x1896   :  { %v1867_v13 = vmul.f32 %v1865_v9, %v1857_v12 }
0x1898   :  { %1869 = vrot.lane.b32.xlu0 %v1867_v13, %s2519_s20 }
0x190a   :  { %v1870_v16 = vpop.permute.xlu0 %1869 }
0x190b   :  { %v1872_v17 = vsel %vm253_vm6, %v1870_v16, 0.0 }
0x190c   :  { %1873 = vadd.xlane.f32.xlu1 %v1872_v17 }
0x1999   :  { %v1874_v57 = vpop.xlane.xlu1 %1873 }
0x199a   :  { %v1882_v21 = vadd.f32 %v1923_v19, %v1874_v57 }
0x199c   :  { %1884 = vst.msk [vmem:[%s2994_s8] sm:$0xff] %vm1883_vm8, %v1882_v21 }

</bundles_post_ra>
